<compile_context>
chip_gen: v7x
topology: tpu7x:2x2x1
jax: 0.10.0
libtpu: 0.0.40
codegen_flags: <defaults>
</compile_context>

<pallas_src>
import functools
import math

import jax
import jax.numpy as jnp
from jax import lax
from jax.experimental import pallas as pl
from jax.experimental.pallas import tpu as pltpu

H0, H2C, H1 = 8, 16, 8          # conv channel widths fixed by the module


def _round_up(n, m):
    return ((n + m - 1) // m) * m


# ----------------------------------------------------------------------------
# Fused actor kernel: one batch tile (TB samples) per grid step
# ----------------------------------------------------------------------------
def _actor_kernel(x_ref, w0_ref, w0t_ref, w1s_ref, w2s_ref, bp_ref, wout_ref,
                  o_ref, phi0_ref, phi1_ref, *,
                  H, Kt, W, Wp, TB, use_tanh_gate, action_scale):
    LP = Wp * TB               # lane stride of one (padded-width) spatial row
    NQ0 = H * LP               # conv0 output lane extent
    NQ1 = Kt * LP              # conv1 output lane extent
    relu = lambda v: jnp.maximum(v, 0.0)

    bp = bp_ref[...]           # (48, 1) packed per-channel scalars
    b0, b1, b2 = bp[0:8, :], bp[8:24, :], bp[24:32, :]
    w3a, w3w0, b3 = bp[32:40, :], bp[40:41, :], bp[41:42, :]
    bout = bp[42:47, :]        # (A, 1)
    wout = wout_ref[...]       # (A, A); column 0 multiplies the cash bias

    # ---- conv0 (3x3, pad 1): 9 per-tap dots, all rows*width*batch on lanes --
    # Per-tap shifted views are lane offsets that are multiples of TB (aligned
    # vreg slices); junk is computed only in the padded-width columns, which
    # later stages never read.
    phi0_ref[...] = jnp.dot(w0t_ref[0], x_ref[0, :, 0:NQ0],
                            preferred_element_type=jnp.float32)
    for k in range(1, 9):
        di, dj = divmod(k, 3)
        off = (di * Wp + dj) * TB
        phi0_ref[...] += jnp.dot(w0t_ref[k], x_ref[0, :, off:off + NQ0],
                                 preferred_element_type=jnp.float32)
    phi0_ref[...] = relu(phi0_ref[...] + b0)

    # ---- conv1 ((3,1), valid) + ReLU: 3 time-tap dots -----------------------
    phi1_ref[...] = jnp.dot(w1s_ref[0], phi0_ref[:, 0:NQ1],
                            preferred_element_type=jnp.float32)
    for dt in range(1, 3):
        phi1_ref[...] += jnp.dot(w1s_ref[dt],
                                 phi0_ref[:, dt * LP:dt * LP + NQ1],
                                 preferred_element_type=jnp.float32)
    phi1_ref[...] = relu(phi1_ref[...] + b1)

    # ---- conv2 ((Kt,1), stride Kt) -> single output row + ReLU --------------
    acc2 = jnp.dot(w2s_ref[0], phi1_ref[:, 0:LP],
                   preferred_element_type=jnp.float32)
    for dt in range(1, Kt):
        acc2 = acc2 + jnp.dot(w2s_ref[dt], phi1_ref[:, dt * LP:(dt + 1) * LP],
                              preferred_element_type=jnp.float32)
    phi2 = relu(acc2 + b2)                                    # (H1, LP)

    # ---- channel-concat w0 + conv3 (1x1, 9 -> 1) on the VPU/XLU -------------
    c3 = (jnp.sum(phi2 * w3a, axis=0, keepdims=True)
          + w3w0 * w0_ref[0] + b3)                            # (1, LP)

    # ---- cash-bias concat + optional tanh gate + Linear(5,5) + ReLU ---------
    if use_tanh_gate:
        a_rest = action_scale * jnp.tanh(c3)
        cash = action_scale * math.tanh(1.0)
    else:
        a_rest = c3
        cash = 1.0
    out = bout + cash * wout[:, 0:1]                          # (A, 1)
    for j in range(W):
        out = out + wout[:, j + 1:j + 2] * a_rest[:, j * TB:(j + 1) * TB]
    o_ref[0] = relu(out)                                      # (A, TB) slab


# ----------------------------------------------------------------------------
# Parameters: raw (PyTorch shapes) and hoisted kernel-layout versions
# ----------------------------------------------------------------------------
def init_params(key, features, T, action_dim):
    stride_time = T - 1 - 2
    assert action_dim == 5, "nn.Linear(5, 5) in the module fixes action_dim to 5"

    def uniform(k, shape, fan_in):
        b = 1.0 / math.sqrt(float(fan_in))
        return jax.random.uniform(k, shape, jnp.float32, -b, b)

    ks = jax.random.split(key, 10)
    return {
        "c0w": uniform(ks[0], (H0, features, 3, 3), features * 9),
        "c0b": uniform(ks[1], (H0,), features * 9),
        "c1w": uniform(ks[2], (H2C, H0, 3, 1), H0 * 3),
        "c1b": uniform(ks[3], (H2C,), H0 * 3),
        "c2w": uniform(ks[4], (H1, H2C, stride_time, 1), H2C * stride_time),
        "c2b": uniform(ks[5], (H1,), H2C * stride_time),
        "c3w": uniform(ks[6], (1, H1 + 1, 1, 1), H1 + 1),
        "c3b": uniform(ks[7], (1,), H1 + 1),
        "ow":  uniform(ks[8], (5, 5), 5),
        "ob":  uniform(ks[9], (5,), 5),
    }


def prepare_params(params):
    """Weight reshapes / packing hoisted out of the forward pass (done once)."""
    F = params["c0w"].shape[1]
    Kt = params["c2w"].shape[2]
    w0t = params["c0w"].transpose(2, 3, 0, 1).reshape(9, H0, F)   # (tap, h0, F)
    w1s = params["c1w"][:, :, :, 0].transpose(2, 0, 1)            # (3, h2, h0)
    w2s = params["c2w"][:, :, :, 0].transpose(2, 0, 1)            # (Kt, h1, h2)
    w3 = params["c3w"][0, :, 0, 0]                                # (h1 + 1,)

    bpack = jnp.zeros((48, 1), jnp.float32)
    bpack = bpack.at[0:8, 0].set(params["c0b"])
    bpack = bpack.at[8:24, 0].set(params["c1b"])
    bpack = bpack.at[24:32, 0].set(params["c2b"])
    bpack = bpack.at[32:40, 0].set(w3[:H1])
    bpack = bpack.at[40, 0].set(w3[H1])
    bpack = bpack.at[41, 0].set(params["c3b"][0])
    bpack = bpack.at[42:47, 0].set(params["ob"])
    return {"w0t": w0t, "w1s": w1s, "w2s": w2s, "bpack": bpack,
            "wout": params["ow"]}


# ----------------------------------------------------------------------------
# Forward pass: one fused pallas_call, lane-dense batch tiles
# ----------------------------------------------------------------------------
def actor_forward(x, kp, *, use_tanh_gate=True, action_scale=1.0,
                  batch_norm=False, batch_tile=128):
    assert not batch_norm, "TODO(synk): batch_norm=True path is not implemented"
    assert batch_tile % 32 == 0
    B, F, T, W = x.shape
    H = T - 1                     # height after x[:, :, 1:, :]
    Kt = H - 2                    # conv1 out height == conv2 kernel/stride
    A = W + 1                     # Linear(5, 5): cash bias + W assets
    Wp = W + 2                    # padded width kept through conv0/1/2
    Rr = H + 3                    # padded rows (+1 top, +2 bottom for tap reach)
    assert A == 5, "nn.Linear(5, 5) in the module fixes action_dim to 5"

    TB = int(min(batch_tile, _round_up(B, 32)))   # W*TB is a multiple of 128
    Bp = _round_up(B, TB)
    NB = Bp // TB
    LP = Wp * TB

    # --- wrapper-side layout plumbing (pad + transpose, whole batch, once) ---
    xb = jnp.pad(x.astype(jnp.float32), ((0, Bp - B), (0, 0), (0, 0), (0, 0)))
    w0 = xb[:, 0, 0, :]                                       # (Bp, W)
    xc = xb[:, :, 1:, :]                                      # (Bp, F, H, W)
    xp = jnp.pad(xc, ((0, 0), (0, 0), (1, 2), (1, 1)))        # (Bp, F, Rr, Wp)
    x_l = (xp.reshape(NB, TB, F, Rr, Wp)
             .transpose(0, 2, 3, 4, 1)
             .reshape(NB, F, Rr * LP))                        # lane=(r*Wp+c)*TB+b
    w0p = jnp.pad(w0, ((0, 0), (0, Wp - W)))                  # (Bp, Wp)
    w0_l = (w0p.reshape(NB, TB, Wp)
               .transpose(0, 2, 1)
               .reshape(NB, 1, LP))                           # lane=c*TB+b

    kernel = functools.partial(
        _actor_kernel, H=H, Kt=Kt, W=W, Wp=Wp, TB=TB,
        use_tanh_gate=use_tanh_gate, action_scale=float(action_scale))

    out = pl.pallas_call(
        kernel,
        out_shape=jax.ShapeDtypeStruct((NB, A, TB), jnp.float32),
        grid=(NB,),
        in_specs=[
            pl.BlockSpec((1, F, Rr * LP), lambda nb: (nb, 0, 0)),   # padded x
            pl.BlockSpec((1, 1, LP), lambda nb: (nb, 0, 0)),        # w0 row
            pl.BlockSpec((9, H0, F), lambda nb: (0, 0, 0)),         # conv0 taps
            pl.BlockSpec((3, H2C, H0), lambda nb: (0, 0, 0)),       # conv1 taps
            pl.BlockSpec((Kt, H1, H2C), lambda nb: (0, 0, 0)),      # conv2 taps
            pl.BlockSpec((48, 1), lambda nb: (0, 0)),               # packed scalars
            pl.BlockSpec((A, A), lambda nb: (0, 0)),                # out.weight
        ],
        out_specs=pl.BlockSpec((1, A, TB), lambda nb: (nb, 0, 0)),
        scratch_shapes=[
            pltpu.VMEM((H0, H * LP), jnp.float32),                  # phi0
            pltpu.VMEM((H2C, Kt * LP), jnp.float32),                # phi1
        ],
        compiler_params=pltpu.CompilerParams(
            dimension_semantics=("parallel",)),
    )(x_l, w0_l, kp["w0t"], kp["w1s"], kp["w2s"], kp["bpack"], kp["wout"])

    return out.transpose(0, 2, 1).reshape(Bp, A)[:B]


# ----------------------------------------------------------------------------
# Pure-JAX reference (lax convs) for validation
# ----------------------------------------------------------------------------
def actor_forward_ref(x, params, *, use_tanh_gate=True, action_scale=1.0):
    Kt = x.shape[2] - 1 - 2
    dn = ("NCHW", "OIHW", "NCHW")
    relu = lambda v: jnp.maximum(v, 0.0)
    w0 = x[:, :1, :1, :]
    xc = x[:, :, 1:, :]
    phi0 = relu(lax.conv_general_dilated(xc, params["c0w"], (1, 1),
                                         ((1, 1), (1, 1)), dimension_numbers=dn)
                + params["c0b"][None, :, None, None])
    phi1 = relu(lax.conv_general_dilated(phi0, params["c1w"], (1, 1), "VALID",
                                         dimension_numbers=dn)
                + params["c1b"][None, :, None, None])
    phi2 = relu(lax.conv_general_dilated(phi1, params["c2w"], (Kt, 1), "VALID",
                                         dimension_numbers=dn)
                + params["c2b"][None, :, None, None])
    phi2h = jnp.concatenate([phi2, w0], axis=1)
    act = (lax.conv_general_dilated(phi2h, params["c3w"], (1, 1), "VALID",
                                    dimension_numbers=dn)
           + params["c3b"][None, :, None, None])               # (B,1,1,W)
    cash = jnp.ones(act.shape[:-1] + (1,), act.dtype)
    act = jnp.concatenate([cash, act], axis=-1).reshape(x.shape[0], -1)
    if use_tanh_gate:
        act = action_scale * jnp.tanh(act)
    return relu(act @ params["ow"].T + params["ob"][None, :])


if __name__ == "__main__":
    # state_dim = (features=4, T=8) -> stride_time = 8 - 1 - 2 = 5
    # action_dim = 5 (cash + 4 assets) -> spatial width W = 4 (Linear(5,5))
    F, T, A_DIM = 4, 8, 5
    W = A_DIM - 1

    key = jax.random.PRNGKey(0)
    kx, kp = jax.random.split(key)
    params = init_params(kp, F, T, A_DIM)
    kparams = prepare_params(params)

    fwd = jax.jit(actor_forward,
                  static_argnames=("use_tanh_gate", "action_scale",
                                   "batch_norm", "batch_tile"))

    # B=2: tiny-batch path (TB=32).  B=200: batch padding + multi-step grid
    # with the full lane-dense TB=128 tiles.
    for B in (2, 200):
        x = jax.random.normal(jax.random.fold_in(kx, B), (B, F, T, W),
                              dtype=jnp.float32)
        for gate in (True, False):
            out = jax.block_until_ready(fwd(x, kparams, use_tanh_gate=gate))
            ref = jax.block_until_ready(
                actor_forward_ref(x, params, use_tanh_gate=gate))
            assert out.shape == (B, A_DIM), out.shape
            assert jnp.allclose(out, ref, atol=1e-3, rtol=1e-3), (B, gate)

    print("KERNEL_OK")
</pallas_src>

<mosaic_0001>
module attributes {stable_mosaic.version = 11 : i64} {
  func.func @_actor_kernel(%arg0: i32, %arg1: memref<1x4x1920xf32, #tpu.memory_space<vmem>>, %arg2: memref<1x1x192xf32, #tpu.memory_space<vmem>>, %arg3: memref<9x8x4xf32, #tpu.memory_space<vmem>>, %arg4: memref<3x16x8xf32, #tpu.memory_space<vmem>>, %arg5: memref<5x8x16xf32, #tpu.memory_space<vmem>>, %arg6: memref<48x1xf32, #tpu.memory_space<vmem>>, %arg7: memref<5x5xf32, #tpu.memory_space<vmem>>, %arg8: memref<1x5x32xf32, #tpu.memory_space<vmem>>, %arg9: memref<8x1344xf32, #tpu.memory_space<vmem>>, %arg10: memref<16x960xf32, #tpu.memory_space<vmem>>) attributes {dimension_semantics = [#tpu.dimension_semantics<parallel>], iteration_bounds = array<i64: 1>, scalar_prefetch = 0 : i64, scratch_operands = 2 : i64, tpu.core_type = #tpu.core_type<tc>, window_params = [{transform_indices = @transform_0, window_bounds = array<i64: 1, 4, 1920>}, {transform_indices = @transform_1, window_bounds = array<i64: 1, 1, 192>}, {pipeline_mode = #tpu.pipeline_mode<synchronous>, transform_indices = @transform_2, window_bounds = array<i64: 9, 8, 4>}, {pipeline_mode = #tpu.pipeline_mode<synchronous>, transform_indices = @transform_3, window_bounds = array<i64: 3, 16, 8>}, {pipeline_mode = #tpu.pipeline_mode<synchronous>, transform_indices = @transform_4, window_bounds = array<i64: 5, 8, 16>}, {pipeline_mode = #tpu.pipeline_mode<synchronous>, transform_indices = @transform_5, window_bounds = array<i64: 48, 1>}, {pipeline_mode = #tpu.pipeline_mode<synchronous>, transform_indices = @transform_6, window_bounds = array<i64: 5, 5>}, {transform_indices = @transform_7, window_bounds = array<i64: 1, 5, 32>}]} {
    %c0 = arith.constant 0 : index
    %c0_0 = arith.constant 0 : index
    %0 = vector.load %arg6[%c0, %c0_0] : memref<48x1xf32, #tpu.memory_space<vmem>>, vector<48x1xf32>
    %1 = vector.extract_strided_slice %0 {offsets = [0, 0], sizes = [8, 1], strides = [1, 1]} : vector<48x1xf32> to vector<8x1xf32>
    %2 = vector.extract_strided_slice %0 {offsets = [8, 0], sizes = [16, 1], strides = [1, 1]} : vector<48x1xf32> to vector<16x1xf32>
    %3 = vector.extract_strided_slice %0 {offsets = [24, 0], sizes = [8, 1], strides = [1, 1]} : vector<48x1xf32> to vector<8x1xf32>
    %4 = vector.extract_strided_slice %0 {offsets = [32, 0], sizes = [8, 1], strides = [1, 1]} : vector<48x1xf32> to vector<8x1xf32>
    %5 = vector.extract_strided_slice %0 {offsets = [40, 0], sizes = [1, 1], strides = [1, 1]} : vector<48x1xf32> to vector<1x1xf32>
    %6 = vector.extract_strided_slice %0 {offsets = [41, 0], sizes = [1, 1], strides = [1, 1]} : vector<48x1xf32> to vector<1x1xf32>
    %7 = vector.extract_strided_slice %0 {offsets = [42, 0], sizes = [5, 1], strides = [1, 1]} : vector<48x1xf32> to vector<5x1xf32>
    %c0_1 = arith.constant 0 : index
    %c0_2 = arith.constant 0 : index
    %8 = vector.load %arg7[%c0_1, %c0_2] : memref<5x5xf32, #tpu.memory_space<vmem>>, vector<5x5xf32>
    %c0_3 = arith.constant 0 : index
    %c0_4 = arith.constant 0 : index
    %c0_5 = arith.constant 0 : index
    %9 = vector.load %arg3[%c0_3, %c0_4, %c0_5] : memref<9x8x4xf32, #tpu.memory_space<vmem>>, vector<1x8x4xf32>
    %10 = vector.shape_cast %9 : vector<1x8x4xf32> to vector<8x4xf32>
    %c0_6 = arith.constant 0 : index
    %c0_7 = arith.constant 0 : index
    %c0_8 = arith.constant 0 : index
    %11 = vector.load %arg1[%c0_6, %c0_7, %c0_8] : memref<1x4x1920xf32, #tpu.memory_space<vmem>>, vector<1x4x1344xf32>
    %12 = vector.shape_cast %11 : vector<1x4x1344xf32> to vector<4x1344xf32>
    %cst = arith.constant dense<0.000000e+00> : vector<8x1344xf32>
    %13 = tpu.matmul %10, %12, %cst {dimension_numbers = #tpu.dot_dimension_numbers<[1], [0], [0], [1], [0, 0, 1, 1], [], []>} : vector<8x4xf32>, vector<4x1344xf32>, vector<8x1344xf32> -> vector<8x1344xf32>
    %c0_9 = arith.constant 0 : index
    %c0_10 = arith.constant 0 : index
    %14 = vector.load %arg9[%c0_9, %c0_10] : memref<8x1344xf32, #tpu.memory_space<vmem>>, vector<8x1344xf32>
    tpu.vector_store %arg9[%c0_9, %c0_10], %13 {strides = array<i32>} : memref<8x1344xf32, #tpu.memory_space<vmem>>, vector<8x1344xf32>,
    %c0_11 = arith.constant 0 : index
    %c0_12 = arith.constant 0 : index
    %15 = vector.load %arg9[%c0_11, %c0_12] : memref<8x1344xf32, #tpu.memory_space<vmem>>, vector<8x1344xf32>
    %c1 = arith.constant 1 : index
    %c0_13 = arith.constant 0 : index
    %c0_14 = arith.constant 0 : index
    %16 = vector.load %arg3[%c1, %c0_13, %c0_14] : memref<9x8x4xf32, #tpu.memory_space<vmem>>, vector<1x8x4xf32>
    %17 = vector.shape_cast %16 : vector<1x8x4xf32> to vector<8x4xf32>
    %c0_15 = arith.constant 0 : index
    %c0_16 = arith.constant 0 : index
    %c32 = arith.constant 32 : index
    %18 = vector.load %arg1[%c0_15, %c0_16, %c32] : memref<1x4x1920xf32, #tpu.memory_space<vmem>>, vector<1x4x1344xf32>
    %19 = vector.shape_cast %18 : vector<1x4x1344xf32> to vector<4x1344xf32>
    %cst_17 = arith.constant dense<0.000000e+00> : vector<8x1344xf32>
    %20 = tpu.matmul %17, %19, %cst_17 {dimension_numbers = #tpu.dot_dimension_numbers<[1], [0], [0], [1], [0, 0, 1, 1], [], []>} : vector<8x4xf32>, vector<4x1344xf32>, vector<8x1344xf32> -> vector<8x1344xf32>
    %21 = arith.addf %15, %20 : vector<8x1344xf32>
    %c0_18 = arith.constant 0 : index
    %c0_19 = arith.constant 0 : index
    %22 = vector.load %arg9[%c0_18, %c0_19] : memref<8x1344xf32, #tpu.memory_space<vmem>>, vector<8x1344xf32>
    tpu.vector_store %arg9[%c0_18, %c0_19], %21 {strides = array<i32>} : memref<8x1344xf32, #tpu.memory_space<vmem>>, vector<8x1344xf32>,
    %c0_20 = arith.constant 0 : index
    %c0_21 = arith.constant 0 : index
    %23 = vector.load %arg9[%c0_20, %c0_21] : memref<8x1344xf32, #tpu.memory_space<vmem>>, vector<8x1344xf32>
    %c2 = arith.constant 2 : index
    %c0_22 = arith.constant 0 : index
    %c0_23 = arith.constant 0 : index
    %24 = vector.load %arg3[%c2, %c0_22, %c0_23] : memref<9x8x4xf32, #tpu.memory_space<vmem>>, vector<1x8x4xf32>
    %25 = vector.shape_cast %24 : vector<1x8x4xf32> to vector<8x4xf32>
    %c0_24 = arith.constant 0 : index
    %c0_25 = arith.constant 0 : index
    %c64 = arith.constant 64 : index
    %26 = vector.load %arg1[%c0_24, %c0_25, %c64] : memref<1x4x1920xf32, #tpu.memory_space<vmem>>, vector<1x4x1344xf32>
    %27 = vector.shape_cast %26 : vector<1x4x1344xf32> to vector<4x1344xf32>
    %cst_26 = arith.constant dense<0.000000e+00> : vector<8x1344xf32>
    %28 = tpu.matmul %25, %27, %cst_26 {dimension_numbers = #tpu.dot_dimension_numbers<[1], [0], [0], [1], [0, 0, 1, 1], [], []>} : vector<8x4xf32>, vector<4x1344xf32>, vector<8x1344xf32> -> vector<8x1344xf32>
    %29 = arith.addf %23, %28 : vector<8x1344xf32>
    %c0_27 = arith.constant 0 : index
    %c0_28 = arith.constant 0 : index
    %30 = vector.load %arg9[%c0_27, %c0_28] : memref<8x1344xf32, #tpu.memory_space<vmem>>, vector<8x1344xf32>
    tpu.vector_store %arg9[%c0_27, %c0_28], %29 {strides = array<i32>} : memref<8x1344xf32, #tpu.memory_space<vmem>>, vector<8x1344xf32>,
    %c0_29 = arith.constant 0 : index
    %c0_30 = arith.constant 0 : index
    %31 = vector.load %arg9[%c0_29, %c0_30] : memref<8x1344xf32, #tpu.memory_space<vmem>>, vector<8x1344xf32>
    %c3 = arith.constant 3 : index
    %c0_31 = arith.constant 0 : index
    %c0_32 = arith.constant 0 : index
    %32 = vector.load %arg3[%c3, %c0_31, %c0_32] : memref<9x8x4xf32, #tpu.memory_space<vmem>>, vector<1x8x4xf32>
    %33 = vector.shape_cast %32 : vector<1x8x4xf32> to vector<8x4xf32>
    %c0_33 = arith.constant 0 : index
    %c0_34 = arith.constant 0 : index
    %c192 = arith.constant 192 : index
    %34 = vector.load %arg1[%c0_33, %c0_34, %c192] : memref<1x4x1920xf32, #tpu.memory_space<vmem>>, vector<1x4x1344xf32>
    %35 = vector.shape_cast %34 : vector<1x4x1344xf32> to vector<4x1344xf32>
    %cst_35 = arith.constant dense<0.000000e+00> : vector<8x1344xf32>
    %36 = tpu.matmul %33, %35, %cst_35 {dimension_numbers = #tpu.dot_dimension_numbers<[1], [0], [0], [1], [0, 0, 1, 1], [], []>} : vector<8x4xf32>, vector<4x1344xf32>, vector<8x1344xf32> -> vector<8x1344xf32>
    %37 = arith.addf %31, %36 : vector<8x1344xf32>
    %c0_36 = arith.constant 0 : index
    %c0_37 = arith.constant 0 : index
    %38 = vector.load %arg9[%c0_36, %c0_37] : memref<8x1344xf32, #tpu.memory_space<vmem>>, vector<8x1344xf32>
    tpu.vector_store %arg9[%c0_36, %c0_37], %37 {strides = array<i32>} : memref<8x1344xf32, #tpu.memory_space<vmem>>, vector<8x1344xf32>,
    %c0_38 = arith.constant 0 : index
    %c0_39 = arith.constant 0 : index
    %39 = vector.load %arg9[%c0_38, %c0_39] : memref<8x1344xf32, #tpu.memory_space<vmem>>, vector<8x1344xf32>
    %c4 = arith.constant 4 : index
    %c0_40 = arith.constant 0 : index
    %c0_41 = arith.constant 0 : index
    %40 = vector.load %arg3[%c4, %c0_40, %c0_41] : memref<9x8x4xf32, #tpu.memory_space<vmem>>, vector<1x8x4xf32>
    %41 = vector.shape_cast %40 : vector<1x8x4xf32> to vector<8x4xf32>
    %c0_42 = arith.constant 0 : index
    %c0_43 = arith.constant 0 : index
    %c224 = arith.constant 224 : index
    %42 = vector.load %arg1[%c0_42, %c0_43, %c224] : memref<1x4x1920xf32, #tpu.memory_space<vmem>>, vector<1x4x1344xf32>
    %43 = vector.shape_cast %42 : vector<1x4x1344xf32> to vector<4x1344xf32>
    %cst_44 = arith.constant dense<0.000000e+00> : vector<8x1344xf32>
    %44 = tpu.matmul %41, %43, %cst_44 {dimension_numbers = #tpu.dot_dimension_numbers<[1], [0], [0], [1], [0, 0, 1, 1], [], []>} : vector<8x4xf32>, vector<4x1344xf32>, vector<8x1344xf32> -> vector<8x1344xf32>
    %45 = arith.addf %39, %44 : vector<8x1344xf32>
    %c0_45 = arith.constant 0 : index
    %c0_46 = arith.constant 0 : index
    %46 = vector.load %arg9[%c0_45, %c0_46] : memref<8x1344xf32, #tpu.memory_space<vmem>>, vector<8x1344xf32>
    tpu.vector_store %arg9[%c0_45, %c0_46], %45 {strides = array<i32>} : memref<8x1344xf32, #tpu.memory_space<vmem>>, vector<8x1344xf32>,
    %c0_47 = arith.constant 0 : index
    %c0_48 = arith.constant 0 : index
    %47 = vector.load %arg9[%c0_47, %c0_48] : memref<8x1344xf32, #tpu.memory_space<vmem>>, vector<8x1344xf32>
    %c5 = arith.constant 5 : index
    %c0_49 = arith.constant 0 : index
    %c0_50 = arith.constant 0 : index
    %48 = vector.load %arg3[%c5, %c0_49, %c0_50] : memref<9x8x4xf32, #tpu.memory_space<vmem>>, vector<1x8x4xf32>
    %49 = vector.shape_cast %48 : vector<1x8x4xf32> to vector<8x4xf32>
    %c0_51 = arith.constant 0 : index
    %c0_52 = arith.constant 0 : index
    %c256 = arith.constant 256 : index
    %50 = vector.load %arg1[%c0_51, %c0_52, %c256] : memref<1x4x1920xf32, #tpu.memory_space<vmem>>, vector<1x4x1344xf32>
    %51 = vector.shape_cast %50 : vector<1x4x1344xf32> to vector<4x1344xf32>
    %cst_53 = arith.constant dense<0.000000e+00> : vector<8x1344xf32>
    %52 = tpu.matmul %49, %51, %cst_53 {dimension_numbers = #tpu.dot_dimension_numbers<[1], [0], [0], [1], [0, 0, 1, 1], [], []>} : vector<8x4xf32>, vector<4x1344xf32>, vector<8x1344xf32> -> vector<8x1344xf32>
    %53 = arith.addf %47, %52 : vector<8x1344xf32>
    %c0_54 = arith.constant 0 : index
    %c0_55 = arith.constant 0 : index
    %54 = vector.load %arg9[%c0_54, %c0_55] : memref<8x1344xf32, #tpu.memory_space<vmem>>, vector<8x1344xf32>
    tpu.vector_store %arg9[%c0_54, %c0_55], %53 {strides = array<i32>} : memref<8x1344xf32, #tpu.memory_space<vmem>>, vector<8x1344xf32>,
    %c0_56 = arith.constant 0 : index
    %c0_57 = arith.constant 0 : index
    %55 = vector.load %arg9[%c0_56, %c0_57] : memref<8x1344xf32, #tpu.memory_space<vmem>>, vector<8x1344xf32>
    %c6 = arith.constant 6 : index
    %c0_58 = arith.constant 0 : index
    %c0_59 = arith.constant 0 : index
    %56 = vector.load %arg3[%c6, %c0_58, %c0_59] : memref<9x8x4xf32, #tpu.memory_space<vmem>>, vector<1x8x4xf32>
    %57 = vector.shape_cast %56 : vector<1x8x4xf32> to vector<8x4xf32>
    %c0_60 = arith.constant 0 : index
    %c0_61 = arith.constant 0 : index
    %c384 = arith.constant 384 : index
    %58 = vector.load %arg1[%c0_60, %c0_61, %c384] : memref<1x4x1920xf32, #tpu.memory_space<vmem>>, vector<1x4x1344xf32>
    %59 = vector.shape_cast %58 : vector<1x4x1344xf32> to vector<4x1344xf32>
    %cst_62 = arith.constant dense<0.000000e+00> : vector<8x1344xf32>
    %60 = tpu.matmul %57, %59, %cst_62 {dimension_numbers = #tpu.dot_dimension_numbers<[1], [0], [0], [1], [0, 0, 1, 1], [], []>} : vector<8x4xf32>, vector<4x1344xf32>, vector<8x1344xf32> -> vector<8x1344xf32>
    %61 = arith.addf %55, %60 : vector<8x1344xf32>
    %c0_63 = arith.constant 0 : index
    %c0_64 = arith.constant 0 : index
    %62 = vector.load %arg9[%c0_63, %c0_64] : memref<8x1344xf32, #tpu.memory_space<vmem>>, vector<8x1344xf32>
    tpu.vector_store %arg9[%c0_63, %c0_64], %61 {strides = array<i32>} : memref<8x1344xf32, #tpu.memory_space<vmem>>, vector<8x1344xf32>,
    %c0_65 = arith.constant 0 : index
    %c0_66 = arith.constant 0 : index
    %63 = vector.load %arg9[%c0_65, %c0_66] : memref<8x1344xf32, #tpu.memory_space<vmem>>, vector<8x1344xf32>
    %c7 = arith.constant 7 : index
    %c0_67 = arith.constant 0 : index
    %c0_68 = arith.constant 0 : index
    %64 = vector.load %arg3[%c7, %c0_67, %c0_68] : memref<9x8x4xf32, #tpu.memory_space<vmem>>, vector<1x8x4xf32>
    %65 = vector.shape_cast %64 : vector<1x8x4xf32> to vector<8x4xf32>
    %c0_69 = arith.constant 0 : index
    %c0_70 = arith.constant 0 : index
    %c416 = arith.constant 416 : index
    %66 = vector.load %arg1[%c0_69, %c0_70, %c416] : memref<1x4x1920xf32, #tpu.memory_space<vmem>>, vector<1x4x1344xf32>
    %67 = vector.shape_cast %66 : vector<1x4x1344xf32> to vector<4x1344xf32>
    %cst_71 = arith.constant dense<0.000000e+00> : vector<8x1344xf32>
    %68 = tpu.matmul %65, %67, %cst_71 {dimension_numbers = #tpu.dot_dimension_numbers<[1], [0], [0], [1], [0, 0, 1, 1], [], []>} : vector<8x4xf32>, vector<4x1344xf32>, vector<8x1344xf32> -> vector<8x1344xf32>
    %69 = arith.addf %63, %68 : vector<8x1344xf32>
    %c0_72 = arith.constant 0 : index
    %c0_73 = arith.constant 0 : index
    %70 = vector.load %arg9[%c0_72, %c0_73] : memref<8x1344xf32, #tpu.memory_space<vmem>>, vector<8x1344xf32>
    tpu.vector_store %arg9[%c0_72, %c0_73], %69 {strides = array<i32>} : memref<8x1344xf32, #tpu.memory_space<vmem>>, vector<8x1344xf32>,
    %c0_74 = arith.constant 0 : index
    %c0_75 = arith.constant 0 : index
    %71 = vector.load %arg9[%c0_74, %c0_75] : memref<8x1344xf32, #tpu.memory_space<vmem>>, vector<8x1344xf32>
    %c8 = arith.constant 8 : index
    %c0_76 = arith.constant 0 : index
    %c0_77 = arith.constant 0 : index
    %72 = vector.load %arg3[%c8, %c0_76, %c0_77] : memref<9x8x4xf32, #tpu.memory_space<vmem>>, vector<1x8x4xf32>
    %73 = vector.shape_cast %72 : vector<1x8x4xf32> to vector<8x4xf32>
    %c0_78 = arith.constant 0 : index
    %c0_79 = arith.constant 0 : index
    %c448 = arith.constant 448 : index
    %74 = vector.load %arg1[%c0_78, %c0_79, %c448] : memref<1x4x1920xf32, #tpu.memory_space<vmem>>, vector<1x4x1344xf32>
    %75 = vector.shape_cast %74 : vector<1x4x1344xf32> to vector<4x1344xf32>
    %cst_80 = arith.constant dense<0.000000e+00> : vector<8x1344xf32>
    %76 = tpu.matmul %73, %75, %cst_80 {dimension_numbers = #tpu.dot_dimension_numbers<[1], [0], [0], [1], [0, 0, 1, 1], [], []>} : vector<8x4xf32>, vector<4x1344xf32>, vector<8x1344xf32> -> vector<8x1344xf32>
    %77 = arith.addf %71, %76 : vector<8x1344xf32>
    %c0_81 = arith.constant 0 : index
    %c0_82 = arith.constant 0 : index
    %78 = vector.load %arg9[%c0_81, %c0_82] : memref<8x1344xf32, #tpu.memory_space<vmem>>, vector<8x1344xf32>
    tpu.vector_store %arg9[%c0_81, %c0_82], %77 {strides = array<i32>} : memref<8x1344xf32, #tpu.memory_space<vmem>>, vector<8x1344xf32>,
    %c0_83 = arith.constant 0 : index
    %c0_84 = arith.constant 0 : index
    %79 = vector.load %arg9[%c0_83, %c0_84] : memref<8x1344xf32, #tpu.memory_space<vmem>>, vector<8x1344xf32>
    %80 = vector.broadcast %1 : vector<8x1xf32> to vector<8x1344xf32>
    %81 = arith.addf %79, %80 : vector<8x1344xf32>
    %cst_85 = arith.constant 0.000000e+00 : f32
    %82 = vector.broadcast %cst_85 : f32 to vector<8x1344xf32>
    %83 = arith.maximumf %81, %82 : vector<8x1344xf32>
    %c0_86 = arith.constant 0 : index
    %c0_87 = arith.constant 0 : index
    %84 = vector.load %arg9[%c0_86, %c0_87] : memref<8x1344xf32, #tpu.memory_space<vmem>>, vector<8x1344xf32>
    tpu.vector_store %arg9[%c0_86, %c0_87], %83 {strides = array<i32>} : memref<8x1344xf32, #tpu.memory_space<vmem>>, vector<8x1344xf32>,
    %c0_88 = arith.constant 0 : index
    %c0_89 = arith.constant 0 : index
    %c0_90 = arith.constant 0 : index
    %85 = vector.load %arg4[%c0_88, %c0_89, %c0_90] : memref<3x16x8xf32, #tpu.memory_space<vmem>>, vector<1x16x8xf32>
    %86 = vector.shape_cast %85 : vector<1x16x8xf32> to vector<16x8xf32>
    %c0_91 = arith.constant 0 : index
    %c0_92 = arith.constant 0 : index
    %87 = vector.load %arg9[%c0_91, %c0_92] : memref<8x1344xf32, #tpu.memory_space<vmem>>, vector<8x960xf32>
    %cst_93 = arith.constant dense<0.000000e+00> : vector<16x960xf32>
    %88 = tpu.matmul %86, %87, %cst_93 {dimension_numbers = #tpu.dot_dimension_numbers<[1], [0], [0], [1], [0, 0, 1, 1], [], []>} : vector<16x8xf32>, vector<8x960xf32>, vector<16x960xf32> -> vector<16x960xf32>
    %c0_94 = arith.constant 0 : index
    %c0_95 = arith.constant 0 : index
    %89 = vector.load %arg10[%c0_94, %c0_95] : memref<16x960xf32, #tpu.memory_space<vmem>>, vector<16x960xf32>
    tpu.vector_store %arg10[%c0_94, %c0_95], %88 {strides = array<i32>} : memref<16x960xf32, #tpu.memory_space<vmem>>, vector<16x960xf32>,
    %c0_96 = arith.constant 0 : index
    %c0_97 = arith.constant 0 : index
    %90 = vector.load %arg10[%c0_96, %c0_97] : memref<16x960xf32, #tpu.memory_space<vmem>>, vector<16x960xf32>
    %c1_98 = arith.constant 1 : index
    %c0_99 = arith.constant 0 : index
    %c0_100 = arith.constant 0 : index
    %91 = vector.load %arg4[%c1_98, %c0_99, %c0_100] : memref<3x16x8xf32, #tpu.memory_space<vmem>>, vector<1x16x8xf32>
    %92 = vector.shape_cast %91 : vector<1x16x8xf32> to vector<16x8xf32>
    %c0_101 = arith.constant 0 : index
    %c192_102 = arith.constant 192 : index
    %93 = vector.load %arg9[%c0_101, %c192_102] : memref<8x1344xf32, #tpu.memory_space<vmem>>, vector<8x960xf32>
    %cst_103 = arith.constant dense<0.000000e+00> : vector<16x960xf32>
    %94 = tpu.matmul %92, %93, %cst_103 {dimension_numbers = #tpu.dot_dimension_numbers<[1], [0], [0], [1], [0, 0, 1, 1], [], []>} : vector<16x8xf32>, vector<8x960xf32>, vector<16x960xf32> -> vector<16x960xf32>
    %95 = arith.addf %90, %94 : vector<16x960xf32>
    %c0_104 = arith.constant 0 : index
    %c0_105 = arith.constant 0 : index
    %96 = vector.load %arg10[%c0_104, %c0_105] : memref<16x960xf32, #tpu.memory_space<vmem>>, vector<16x960xf32>
    tpu.vector_store %arg10[%c0_104, %c0_105], %95 {strides = array<i32>} : memref<16x960xf32, #tpu.memory_space<vmem>>, vector<16x960xf32>,
    %c0_106 = arith.constant 0 : index
    %c0_107 = arith.constant 0 : index
    %97 = vector.load %arg10[%c0_106, %c0_107] : memref<16x960xf32, #tpu.memory_space<vmem>>, vector<16x960xf32>
    %c2_108 = arith.constant 2 : index
    %c0_109 = arith.constant 0 : index
    %c0_110 = arith.constant 0 : index
    %98 = vector.load %arg4[%c2_108, %c0_109, %c0_110] : memref<3x16x8xf32, #tpu.memory_space<vmem>>, vector<1x16x8xf32>
    %99 = vector.shape_cast %98 : vector<1x16x8xf32> to vector<16x8xf32>
    %c0_111 = arith.constant 0 : index
    %c384_112 = arith.constant 384 : index
    %100 = vector.load %arg9[%c0_111, %c384_112] : memref<8x1344xf32, #tpu.memory_space<vmem>>, vector<8x960xf32>
    %cst_113 = arith.constant dense<0.000000e+00> : vector<16x960xf32>
    %101 = tpu.matmul %99, %100, %cst_113 {dimension_numbers = #tpu.dot_dimension_numbers<[1], [0], [0], [1], [0, 0, 1, 1], [], []>} : vector<16x8xf32>, vector<8x960xf32>, vector<16x960xf32> -> vector<16x960xf32>
    %102 = arith.addf %97, %101 : vector<16x960xf32>
    %c0_114 = arith.constant 0 : index
    %c0_115 = arith.constant 0 : index
    %103 = vector.load %arg10[%c0_114, %c0_115] : memref<16x960xf32, #tpu.memory_space<vmem>>, vector<16x960xf32>
    tpu.vector_store %arg10[%c0_114, %c0_115], %102 {strides = array<i32>} : memref<16x960xf32, #tpu.memory_space<vmem>>, vector<16x960xf32>,
    %c0_116 = arith.constant 0 : index
    %c0_117 = arith.constant 0 : index
    %104 = vector.load %arg10[%c0_116, %c0_117] : memref<16x960xf32, #tpu.memory_space<vmem>>, vector<16x960xf32>
    %105 = vector.broadcast %2 : vector<16x1xf32> to vector<16x960xf32>
    %106 = arith.addf %104, %105 : vector<16x960xf32>
    %cst_118 = arith.constant 0.000000e+00 : f32
    %107 = vector.broadcast %cst_118 : f32 to vector<16x960xf32>
    %108 = arith.maximumf %106, %107 : vector<16x960xf32>
    %c0_119 = arith.constant 0 : index
    %c0_120 = arith.constant 0 : index
    %109 = vector.load %arg10[%c0_119, %c0_120] : memref<16x960xf32, #tpu.memory_space<vmem>>, vector<16x960xf32>
    tpu.vector_store %arg10[%c0_119, %c0_120], %108 {strides = array<i32>} : memref<16x960xf32, #tpu.memory_space<vmem>>, vector<16x960xf32>,
    %c0_121 = arith.constant 0 : index
    %c0_122 = arith.constant 0 : index
    %c0_123 = arith.constant 0 : index
    %110 = vector.load %arg5[%c0_121, %c0_122, %c0_123] : memref<5x8x16xf32, #tpu.memory_space<vmem>>, vector<1x8x16xf32>
    %111 = vector.shape_cast %110 : vector<1x8x16xf32> to vector<8x16xf32>
    %c0_124 = arith.constant 0 : index
    %c0_125 = arith.constant 0 : index
    %112 = vector.load %arg10[%c0_124, %c0_125] : memref<16x960xf32, #tpu.memory_space<vmem>>, vector<16x192xf32>
    %cst_126 = arith.constant dense<0.000000e+00> : vector<8x192xf32>
    %113 = tpu.matmul %111, %112, %cst_126 {dimension_numbers = #tpu.dot_dimension_numbers<[1], [0], [0], [1], [0, 0, 1, 1], [], []>} : vector<8x16xf32>, vector<16x192xf32>, vector<8x192xf32> -> vector<8x192xf32>
    %c1_127 = arith.constant 1 : index
    %c0_128 = arith.constant 0 : index
    %c0_129 = arith.constant 0 : index
    %114 = vector.load %arg5[%c1_127, %c0_128, %c0_129] : memref<5x8x16xf32, #tpu.memory_space<vmem>>, vector<1x8x16xf32>
    %115 = vector.shape_cast %114 : vector<1x8x16xf32> to vector<8x16xf32>
    %c0_130 = arith.constant 0 : index
    %c192_131 = arith.constant 192 : index
    %116 = vector.load %arg10[%c0_130, %c192_131] : memref<16x960xf32, #tpu.memory_space<vmem>>, vector<16x192xf32>
    %cst_132 = arith.constant dense<0.000000e+00> : vector<8x192xf32>
    %117 = tpu.matmul %115, %116, %cst_132 {dimension_numbers = #tpu.dot_dimension_numbers<[1], [0], [0], [1], [0, 0, 1, 1], [], []>} : vector<8x16xf32>, vector<16x192xf32>, vector<8x192xf32> -> vector<8x192xf32>
    %118 = arith.addf %113, %117 : vector<8x192xf32>
    %c2_133 = arith.constant 2 : index
    %c0_134 = arith.constant 0 : index
    %c0_135 = arith.constant 0 : index
    %119 = vector.load %arg5[%c2_133, %c0_134, %c0_135] : memref<5x8x16xf32, #tpu.memory_space<vmem>>, vector<1x8x16xf32>
    %120 = vector.shape_cast %119 : vector<1x8x16xf32> to vector<8x16xf32>
    %c0_136 = arith.constant 0 : index
    %c384_137 = arith.constant 384 : index
    %121 = vector.load %arg10[%c0_136, %c384_137] : memref<16x960xf32, #tpu.memory_space<vmem>>, vector<16x192xf32>
    %cst_138 = arith.constant dense<0.000000e+00> : vector<8x192xf32>
    %122 = tpu.matmul %120, %121, %cst_138 {dimension_numbers = #tpu.dot_dimension_numbers<[1], [0], [0], [1], [0, 0, 1, 1], [], []>} : vector<8x16xf32>, vector<16x192xf32>, vector<8x192xf32> -> vector<8x192xf32>
    %123 = arith.addf %118, %122 : vector<8x192xf32>
    %c3_139 = arith.constant 3 : index
    %c0_140 = arith.constant 0 : index
    %c0_141 = arith.constant 0 : index
    %124 = vector.load %arg5[%c3_139, %c0_140, %c0_141] : memref<5x8x16xf32, #tpu.memory_space<vmem>>, vector<1x8x16xf32>
    %125 = vector.shape_cast %124 : vector<1x8x16xf32> to vector<8x16xf32>
    %c0_142 = arith.constant 0 : index
    %c576 = arith.constant 576 : index
    %126 = vector.load %arg10[%c0_142, %c576] : memref<16x960xf32, #tpu.memory_space<vmem>>, vector<16x192xf32>
    %cst_143 = arith.constant dense<0.000000e+00> : vector<8x192xf32>
    %127 = tpu.matmul %125, %126, %cst_143 {dimension_numbers = #tpu.dot_dimension_numbers<[1], [0], [0], [1], [0, 0, 1, 1], [], []>} : vector<8x16xf32>, vector<16x192xf32>, vector<8x192xf32> -> vector<8x192xf32>
    %128 = arith.addf %123, %127 : vector<8x192xf32>
    %c4_144 = arith.constant 4 : index
    %c0_145 = arith.constant 0 : index
    %c0_146 = arith.constant 0 : index
    %129 = vector.load %arg5[%c4_144, %c0_145, %c0_146] : memref<5x8x16xf32, #tpu.memory_space<vmem>>, vector<1x8x16xf32>
    %130 = vector.shape_cast %129 : vector<1x8x16xf32> to vector<8x16xf32>
    %c0_147 = arith.constant 0 : index
    %c768 = arith.constant 768 : index
    %131 = vector.load %arg10[%c0_147, %c768] : memref<16x960xf32, #tpu.memory_space<vmem>>, vector<16x192xf32>
    %cst_148 = arith.constant dense<0.000000e+00> : vector<8x192xf32>
    %132 = tpu.matmul %130, %131, %cst_148 {dimension_numbers = #tpu.dot_dimension_numbers<[1], [0], [0], [1], [0, 0, 1, 1], [], []>} : vector<8x16xf32>, vector<16x192xf32>, vector<8x192xf32> -> vector<8x192xf32>
    %133 = arith.addf %128, %132 : vector<8x192xf32>
    %134 = vector.broadcast %3 : vector<8x1xf32> to vector<8x192xf32>
    %135 = arith.addf %133, %134 : vector<8x192xf32>
    %cst_149 = arith.constant 0.000000e+00 : f32
    %136 = vector.broadcast %cst_149 : f32 to vector<8x192xf32>
    %137 = arith.maximumf %135, %136 : vector<8x192xf32>
    %138 = vector.broadcast %4 : vector<8x1xf32> to vector<8x192xf32>
    %139 = arith.mulf %137, %138 : vector<8x192xf32>
    %cst_150 = arith.constant dense<0.000000e+00> : vector<192xf32>
    %140 = vector.multi_reduction <add>, %139, %cst_150 [0] : vector<8x192xf32> to vector<192xf32>
    %141 = vector.shape_cast %140 : vector<192xf32> to vector<1x192xf32>
    %c0_151 = arith.constant 0 : index
    %c0_152 = arith.constant 0 : index
    %c0_153 = arith.constant 0 : index
    %142 = vector.load %arg2[%c0_151, %c0_152, %c0_153] : memref<1x1x192xf32, #tpu.memory_space<vmem>>, vector<1x1x192xf32>
    %143 = vector.shape_cast %142 : vector<1x1x192xf32> to vector<1x192xf32>
    %144 = vector.broadcast %5 : vector<1x1xf32> to vector<1x192xf32>
    %145 = arith.mulf %144, %143 : vector<1x192xf32>
    %146 = arith.addf %141, %145 : vector<1x192xf32>
    %147 = vector.broadcast %6 : vector<1x1xf32> to vector<1x192xf32>
    %148 = arith.addf %146, %147 : vector<1x192xf32>
    %149 = math.tanh %148 : vector<1x192xf32>
    %cst_154 = arith.constant 1.000000e+00 : f32
    %150 = vector.broadcast %cst_154 : f32 to vector<1x192xf32>
    %151 = arith.mulf %150, %149 : vector<1x192xf32>
    %152 = vector.extract_strided_slice %8 {offsets = [0, 0], sizes = [5, 1], strides = [1, 1]} : vector<5x5xf32> to vector<5x1xf32>
    %cst_155 = arith.constant 0.761594176 : f32
    %153 = vector.broadcast %cst_155 : f32 to vector<5x1xf32>
    %154 = arith.mulf %153, %152 : vector<5x1xf32>
    %155 = arith.addf %7, %154 : vector<5x1xf32>
    %156 = vector.extract_strided_slice %8 {offsets = [0, 1], sizes = [5, 1], strides = [1, 1]} : vector<5x5xf32> to vector<5x1xf32>
    %157 = vector.extract_strided_slice %151 {offsets = [0, 0], sizes = [1, 32], strides = [1, 1]} : vector<1x192xf32> to vector<1x32xf32>
    %158 = vector.broadcast %156 : vector<5x1xf32> to vector<5x32xf32>
    %159 = vector.broadcast %157 : vector<1x32xf32> to vector<5x32xf32>
    %160 = arith.mulf %158, %159 : vector<5x32xf32>
    %161 = vector.broadcast %155 : vector<5x1xf32> to vector<5x32xf32>
    %162 = arith.addf %161, %160 : vector<5x32xf32>
    %163 = vector.extract_strided_slice %8 {offsets = [0, 2], sizes = [5, 1], strides = [1, 1]} : vector<5x5xf32> to vector<5x1xf32>
    %164 = vector.extract_strided_slice %151 {offsets = [0, 32], sizes = [1, 32], strides = [1, 1]} : vector<1x192xf32> to vector<1x32xf32>
    %165 = vector.broadcast %163 : vector<5x1xf32> to vector<5x32xf32>
    %166 = vector.broadcast %164 : vector<1x32xf32> to vector<5x32xf32>
    %167 = arith.mulf %165, %166 : vector<5x32xf32>
    %168 = arith.addf %162, %167 : vector<5x32xf32>
    %169 = vector.extract_strided_slice %8 {offsets = [0, 3], sizes = [5, 1], strides = [1, 1]} : vector<5x5xf32> to vector<5x1xf32>
    %170 = vector.extract_strided_slice %151 {offsets = [0, 64], sizes = [1, 32], strides = [1, 1]} : vector<1x192xf32> to vector<1x32xf32>
    %171 = vector.broadcast %169 : vector<5x1xf32> to vector<5x32xf32>
    %172 = vector.broadcast %170 : vector<1x32xf32> to vector<5x32xf32>
    %173 = arith.mulf %171, %172 : vector<5x32xf32>
    %174 = arith.addf %168, %173 : vector<5x32xf32>
    %175 = vector.extract_strided_slice %8 {offsets = [0, 4], sizes = [5, 1], strides = [1, 1]} : vector<5x5xf32> to vector<5x1xf32>
    %176 = vector.extract_strided_slice %151 {offsets = [0, 96], sizes = [1, 32], strides = [1, 1]} : vector<1x192xf32> to vector<1x32xf32>
    %177 = vector.broadcast %175 : vector<5x1xf32> to vector<5x32xf32>
    %178 = vector.broadcast %176 : vector<1x32xf32> to vector<5x32xf32>
    %179 = arith.mulf %177, %178 : vector<5x32xf32>
    %180 = arith.addf %174, %179 : vector<5x32xf32>
    %cst_156 = arith.constant 0.000000e+00 : f32
    %181 = vector.broadcast %cst_156 : f32 to vector<5x32xf32>
    %182 = arith.maximumf %180, %181 : vector<5x32xf32>
    %c0_157 = arith.constant 0 : index
    %c0_158 = arith.constant 0 : index
    %c0_159 = arith.constant 0 : index
    %183 = vector.load %arg8[%c0_157, %c0_158, %c0_159] : memref<1x5x32xf32, #tpu.memory_space<vmem>>, vector<1x5x32xf32>
    %184 = vector.shape_cast %183 : vector<1x5x32xf32> to vector<5x32xf32>
    %185 = vector.shape_cast %182 : vector<5x32xf32> to vector<1x5x32xf32>
    tpu.vector_store %arg8[%c0_157, %c0_158, %c0_159], %185 {strides = array<i32>} : memref<1x5x32xf32, #tpu.memory_space<vmem>>, vector<1x5x32xf32>,
    return
  }
  func.func @transform_0(%arg0: i32) -> (i32, i32, i32) {
    %c0_i32 = arith.constant 0 : i32
    %c0_i32_0 = arith.constant 0 : i32
    %c0_i32_1 = arith.constant 0 : i32
    return %arg0, %c0_i32, %c0_i32_0 : i32, i32, i32
  }
  func.func @transform_1(%arg0: i32) -> (i32, i32, i32) {
    %c0_i32 = arith.constant 0 : i32
    %c0_i32_0 = arith.constant 0 : i32
    %c0_i32_1 = arith.constant 0 : i32
    return %arg0, %c0_i32, %c0_i32_0 : i32, i32, i32
  }
  func.func @transform_2(%arg0: i32) -> (i32, i32, i32) {
    %c0_i32 = arith.constant 0 : i32
    %c0_i32_0 = arith.constant 0 : i32
    %c0_i32_1 = arith.constant 0 : i32
    %c0_i32_2 = arith.constant 0 : i32
    return %c0_i32, %c0_i32_0, %c0_i32_1 : i32, i32, i32
  }
  func.func @transform_3(%arg0: i32) -> (i32, i32, i32) {
    %c0_i32 = arith.constant 0 : i32
    %c0_i32_0 = arith.constant 0 : i32
    %c0_i32_1 = arith.constant 0 : i32
    %c0_i32_2 = arith.constant 0 : i32
    return %c0_i32, %c0_i32_0, %c0_i32_1 : i32, i32, i32
  }
  func.func @transform_4(%arg0: i32) -> (i32, i32, i32) {
    %c0_i32 = arith.constant 0 : i32
    %c0_i32_0 = arith.constant 0 : i32
    %c0_i32_1 = arith.constant 0 : i32
    %c0_i32_2 = arith.constant 0 : i32
    return %c0_i32, %c0_i32_0, %c0_i32_1 : i32, i32, i32
  }
  func.func @transform_5(%arg0: i32) -> (i32, i32) {
    %c0_i32 = arith.constant 0 : i32
    %c0_i32_0 = arith.constant 0 : i32
    %c0_i32_1 = arith.constant 0 : i32
    return %c0_i32, %c0_i32_0 : i32, i32
  }
  func.func @transform_6(%arg0: i32) -> (i32, i32) {
    %c0_i32 = arith.constant 0 : i32
    %c0_i32_0 = arith.constant 0 : i32
    %c0_i32_1 = arith.constant 0 : i32
    return %c0_i32, %c0_i32_0 : i32, i32
  }
  func.func @transform_7(%arg0: i32) -> (i32, i32, i32) {
    %c0_i32 = arith.constant 0 : i32
    %c0_i32_0 = arith.constant 0 : i32
    %c0_i32_1 = arith.constant 0 : i32
    return %arg0, %c0_i32, %c0_i32_0 : i32, i32, i32
  }
}

</mosaic_0001>

<bundles_post_ra>
// kernel: actor_forward.1
= control target key start
LH: loop header
LB: loop body
LE: loop exit
PB: predicated region body
PF: predicated region fallthrough
CT: control target
= control target key end

     0   :  { %vm55_vm0 = vcmask 1043456   ;;  %v6844_v2 = vmov 0.0   ;;  %s6845_s28 = smov 96   ;;  %vm51_vm1 = vcmask 31744   ;;  %vm6846_vm2 = vmmov 0   ;;  %s6847_s18 = smov 64   ;;  %s7769_s0 = inlined_call_operand.vmem [shape: f32[1,4,1920], index: 0, kind: input, shape index: {}]   ;;  %s7770_s2 = inlined_call_operand.vmem [shape: f32[9,8,4], index: 2, kind: input, shape index: {}]   ;;  %s7771_s5 = inlined_call_operand.vmem [shape: f32[48,1], index: 5, kind: input, shape index: {}]   ;;  %s7772_s3 = inlined_call_operand.vmem [shape: f32[3,16,8], index: 3, kind: input, shape index: {}]   ;;  %s7773_s4 = inlined_call_operand.vmem [shape: f32[5,8,16], index: 4, kind: input, shape index: {}]   ;;  %s7774_s6 = inlined_call_operand.vmem [shape: f32[5,5], index: 6, kind: input, shape index: {}]   ;;  %s7775_s1 = inlined_call_operand.vmem [shape: f32[1,1,192], index: 1, kind: input, shape index: {}]   ;;  %s7776_s7 = inlined_call_operand.vmem [shape: f32[1,5,32], index: 7, kind: output, shape index: {}]  }
   0x1   :  { %v6897_v0 = vld [vmem:[%s7769_s0 + $0x8] sm:$0xff]  ;;  %v528_v1 = vld [vmem:[%s7769_s0] sm:$0xff]  ;;  %142 = vmatprep.mubr.f32.mxu0 %v6844_v2  ;;  %213 = vmatprep.mubr.f32.mxu1 %v6844_v2  ;;  %v6914_v5 = vld [vmem:[%s7769_s0 + $0x10] sm:$0xff]  ;;  %s6848_s11 = smov 32   ;;  %vm567_vm3 = vcmask 785408   ;;  %v6849_v42 = vmov 0  }
   0x2   :  { %549 = vrot.lane.b32.xlu0 %v6897_v0, %s6845_s28  ;;  %v6908_v3 = vcombine.high %v6897_v0, %v6897_v0  ;;  %545 = vrot.lane.b32.xlu1 %v528_v1, %s6845_s28  ;;  %v540_v4 = vcombine.high %v528_v1, %v528_v1  ;;  %v6919_v6 = vld [vmem:[%s7769_s0 + $0x20] sm:$0xff]  ;;  %v6926_v7 = vcombine.high %v6914_v5, %v6914_v5  ;;  %v6937_v8 = vld [vmem:[%s7769_s0 + $0x18] sm:$0xff]  ;;  %vm513_vm4 = vcmask 523264  }
   0x3   :  { %v33_v9 = vld [vmem:[%s7770_s2] sm:$0xff]  ;;  %v6944_v10 = vcombine.high %v6919_v6, %v6919_v6  ;;  %v6954_v11 = vcombine.high %v6937_v8, %v6937_v8  ;;  %v39_v12 = vld [vmem:[%s7769_s0 + $0x28] sm:$0xf]  ;;  %v7024_v17 = vld [vmem:[%s7769_s0 + $0xc] sm:$0xff]  ;;  %6802 = vset.pattern.permute.xlu1 %v6849_v42  ;;  %6803 = vset.pattern.permute.xlu0 %v6849_v42  ;;  %vm2173_vm5 = vcmask 261120   ;;  %vm4788_vm6 = vcmask 64512  }
   0x4   :  { %6511 = vmatprep.subr.msk.mxu0 %vm55_vm0, %v540_v4  ;;  %6514 = vmatprep.subr.msk.mxu1 %vm55_vm0, %v6908_v3  ;;  %v533_v13 = vld [vmem:[%s7769_s0 + $0x28] sm:$0xf]  ;;  %v7028_v18 = vcombine.high %v7024_v17, %v7024_v17  ;;  %v7036_v19 = vld [vmem:[%s7769_s0 + $0x14] sm:$0xff]  ;;  %v7048_v21 = vld [vmem:[%s7769_s0 + $0x1c] sm:$0xff]  ;;  %vm6005_vm7 = vcmask 130048   ;;  %vm6505_vm8 = vcmask 260098  }
   0x5   :  { %6512 = vmatpush1.msk.msra.mxu0 %vm55_vm0, %v528_v1  ;;  %6515 = vmatpush1.msk.msra.mxu1 %vm55_vm0, %v6897_v0  ;;  %v1068_v14 = vld [vmem:[%s7769_s0 + $0x28] sm:$0xf]  ;;  %v7043_v20 = vcombine.high %v7036_v19, %v7036_v19  ;;  %v7056_v22 = vcombine.high %v7048_v21, %v7048_v21  ;;  %v1602_v25 = vld [vmem:[%s7769_s0 + $0x2c] sm:$0xf]  ;;  %v3679_v28 = vld [vmem:[%s7769_s0 + $0x34] sm:$0xf] }
   0x6   :  { %551 = vrot.lane.b32.xlu1 %v6908_v3, %s6845_s28  ;;  %547 = vrot.lane.b32.xlu0 %v540_v4, %s6845_s28  ;;  %v1597_v15 = vld [vmem:[%s7769_s0 + $0x4] sm:$0xff]  ;;  %v7098_v26 = vld [vmem:[%s7769_s0 + $0x2c] sm:$0xff] }
   0x7   :  { %6513 = vmatmul.mubr.msk.f32.vlgmr.msra.gmra.mrb[0].mxu0 %vm51_vm1, %v33_v9  ;;  %6517 = vmatprep.subr.msk.mxu0 %vm55_vm0, %v6926_v7  ;;  %v1609_v16 = vcombine.high %v1597_v15, %v1597_v15  ;;  %v7061_v23 = vld [vmem:[%s7769_s0 + $0x24] sm:$0xff]  ;;  %v7102_v27 = vcombine.high %v7098_v26, %v7098_v26  ;;  %v4213_v45 = vld [vmem:[%s7769_s0 + $0x34] sm:$0xf] }
   0x8   :  { %6518 = vmatpush1.msk.msra.mxu0 %vm55_vm0, %v6914_v5  ;;  %284 = vmatprep.mubr.f32.mxu0 %v6844_v2  ;;  %v7069_v24 = vcombine.high %v7061_v23, %v7061_v23  ;;  %v6528_v35 = vld [vmem:[%s7770_s2 + $0x8] sm:$0xff]  ;;  %v26_v48 = vld [vmem:[%s7771_s5] sm:$0xff]  ;;  %v6546_v59 = vld [vmem:[%s7770_s2 + $0x10] sm:$0xff] }
   0x9   :  { %6516 = vmatmul.mubr.msk.f32.vlgmr.msra.gmra.mrb[0].mxu1 %vm51_vm1, %v33_v9  ;;  %6523 = vmatprep.subr.msk.mxu0 %vm55_vm0, %v6944_v10 }
   0xa   :  { %555 = vrot.lane.b32.xlu1 %v6926_v7, %s6845_s28  ;;  %553 = vrot.lane.b32.xlu0 %v6914_v5, %s6845_s28 }
   0xb   :  { %6519 = vmatmul.mubr.msk.f32.vlgmr.msra.gmra.mrb[2].mxu0 %vm51_vm1, %v33_v9  ;;  %6520 = vmatprep.subr.msk.mxu1 %vm55_vm0, %v6954_v11 }
   0xc   :  { %6524 = vmatpush1.msk.msra.mxu0 %vm55_vm0, %v6919_v6  ;;  %6521 = vmatpush1.msk.msra.mxu1 %vm55_vm0, %v6937_v8 }
   0xd   :  { %355 = vmatprep.mubr.f32.mxu1 %v6844_v2  ;;  %426 = vmatprep.mubr.f32.mxu0 %v6844_v2 }
   0xe   :  { %559 = vrot.lane.b32.xlu1 %v6954_v11, %s6845_s28  ;;  %557 = vrot.lane.b32.xlu0 %v6937_v8, %s6845_s28 }
   0xf   :  { %6522 = vmatmul.mubr.msk.f32.vlgmr.msra.gmra.mrb[2].mxu1 %vm51_vm1, %v33_v9  ;;  %6525 = vmatmul.mubr.msk.f32.vlgmr.msra.gmra.mrb[4].mxu0 %vm51_vm1, %v33_v9 }
  0x10   :  { %6727 = vmatprep.subr.mxu1 %v6844_v2  ;;  %6729 = vmatprep.mubr.msk.f32.mxu1 %vm6846_vm2, %v6844_v2 }
  0x11   :  { %6728 = vmatpush3.msk.msra.mxu1 %vm55_vm0, %v39_v12  ;;  %667 = vmatprep.mubr.f32.mxu0 %v6844_v2 }
  0x12   :  { %563 = vrot.lane.b32.xlu1 %v6944_v10, %s6845_s28  ;;  %561 = vrot.lane.b32.xlu0 %v6919_v6, %s6845_s28 }
  0x13   :  { %6730 = vmatmul.mubr.msk.f32.vlgmr.msra.gmra.mrb[4].mxu1 %vm51_vm1, %v33_v9 }
  0x14   :  { %738 = vmatprep.mubr.f32.mxu1 %v6844_v2 }
  0x16   :  { %1082 = vrot.lane.b32.xlu1 %v540_v4, %s6847_s18  ;;  %565 = vrot.lane.b32.xlu0 %v533_v13, %s6845_s28 }
  0x1a   :  { %1080 = vrot.lane.b32.xlu1 %v528_v1, %s6847_s18  ;;  %1084 = vrot.lane.b32.xlu0 %v6897_v0, %s6847_s18 }
  0x1e   :  { %1088 = vrot.lane.b32.xlu1 %v6914_v5, %s6847_s18  ;;  %1086 = vrot.lane.b32.xlu0 %v6908_v3, %s6847_s18 }
  0x22   :  { %1092 = vrot.lane.b32.xlu1 %v6937_v8, %s6847_s18  ;;  %1090 = vrot.lane.b32.xlu0 %v6926_v7, %s6847_s18 }
  0x26   :  { %1096 = vrot.lane.b32.xlu1 %v6919_v6, %s6847_s18  ;;  %1094 = vrot.lane.b32.xlu0 %v6954_v11, %s6847_s18 }
  0x2a   :  { %1100 = vrot.lane.b32.xlu1 %v1068_v14, %s6847_s18  ;;  %1098 = vrot.lane.b32.xlu0 %v6944_v10, %s6847_s18 }
  0x2e   :  { %1618 = vrot.lane.b32.xlu1 %v7024_v17, %s6847_s18  ;;  %1616 = vrot.lane.b32.xlu0 %v1609_v16, %s6847_s18 }
  0x32   :  { %1620 = vrot.lane.b32.xlu1 %v7028_v18, %s6847_s18  ;;  %1614 = vrot.lane.b32.xlu0 %v1597_v15, %s6847_s18 }
  0x36   :  { %1624 = vrot.lane.b32.xlu1 %v7043_v20, %s6847_s18  ;;  %1622 = vrot.lane.b32.xlu0 %v7036_v19, %s6847_s18 }
  0x3a   :  { %1628 = vrot.lane.b32.xlu1 %v7056_v22, %s6847_s18  ;;  %1626 = vrot.lane.b32.xlu0 %v7048_v21, %s6847_s18 }
  0x3e   :  { %1632 = vrot.lane.b32.xlu1 %v7069_v24, %s6847_s18  ;;  %1630 = vrot.lane.b32.xlu0 %v7061_v23, %s6847_s18 }
  0x42   :  { %2151 = vrot.lane.b32.xlu1 %v1609_v16, %s6848_s11  ;;  %1634 = vrot.lane.b32.xlu0 %v1602_v25, %s6847_s18 }
  0x46   :  { %2149 = vrot.lane.b32.xlu1 %v1597_v15, %s6848_s11  ;;  %2153 = vrot.lane.b32.xlu0 %v7024_v17, %s6848_s11 }
  0x4a   :  { %2157 = vrot.lane.b32.xlu1 %v7036_v19, %s6848_s11  ;;  %2155 = vrot.lane.b32.xlu0 %v7028_v18, %s6848_s11 }
  0x4e   :  { %2161 = vrot.lane.b32.xlu1 %v7048_v21, %s6848_s11  ;;  %2159 = vrot.lane.b32.xlu0 %v7043_v20, %s6848_s11 }
  0x52   :  { %2165 = vrot.lane.b32.xlu1 %v7061_v23, %s6848_s11  ;;  %2163 = vrot.lane.b32.xlu0 %v7056_v22, %s6848_s11 }
  0x56   :  { %2169 = vrot.lane.b32.xlu1 %v7098_v26, %s6848_s11  ;;  %2167 = vrot.lane.b32.xlu0 %v7069_v24, %s6848_s11 }
  0x5a   :  { %2171 = vrot.lane.b32.xlu0 %v7102_v27, %s6848_s11  ;;  %3693 = vrot.lane.b32.xlu1 %v7028_v18, %s6845_s28 }
  0x5e   :  { %3695 = vrot.lane.b32.xlu0 %v7036_v19, %s6845_s28  ;;  %3691 = vrot.lane.b32.xlu1 %v7024_v17, %s6845_s28 }
  0x62   :  { %3697 = vrot.lane.b32.xlu0 %v7043_v20, %s6845_s28  ;;  %3699 = vrot.lane.b32.xlu1 %v7048_v21, %s6845_s28 }
  0x66   :  { %3701 = vrot.lane.b32.xlu0 %v7056_v22, %s6845_s28  ;;  %3703 = vrot.lane.b32.xlu1 %v7061_v23, %s6845_s28 }
  0x6a   :  { %3705 = vrot.lane.b32.xlu0 %v7069_v24, %s6845_s28  ;;  %3707 = vrot.lane.b32.xlu1 %v7098_v26, %s6845_s28 }
  0x6e   :  { %3709 = vrot.lane.b32.xlu0 %v7102_v27, %s6845_s28  ;;  %3711 = vrot.lane.b32.xlu1 %v3679_v28, %s6845_s28 }
  0x72   :  { %4227 = vrot.lane.b32.xlu0 %v7028_v18, %s6847_s18  ;;  %4229 = vrot.lane.b32.xlu1 %v7036_v19, %s6847_s18 }
  0x74   :  { %v550_v29 = vpop.permute.xlu0 %549  ;;  %v546_v30 = vpop.permute.xlu1 %545 }
  0x76   :  { %4225 = vrot.lane.b32.xlu0 %v7024_v17, %s6847_s18  ;;  %4231 = vrot.lane.b32.xlu1 %v7043_v20, %s6847_s18 }
  0x78   :  { %v552_v31 = vpop.permute.xlu1 %551  ;;  %v548_v32 = vpop.permute.xlu0 %547 }
  0x79   :  { %v568_v33 = vsel %vm567_vm3, %v546_v30, %v548_v32  ;;  %v569_v34 = vsel %vm567_vm3, %v548_v32, %v550_v29  ;;  %v570_v39 = vsel %vm567_vm3, %v550_v29, %v552_v31 }
  0x7a   :  { %4233 = vrot.lane.b32.xlu0 %v7048_v21, %s6847_s18  ;;  %6529 = vmatprep.subr.msk.mxu0 %vm55_vm0, %v569_v34 }
  0x7b   :  { %6530 = vmatpush1.msk.msra.mxu0 %vm55_vm0, %v568_v33  ;;  %4235 = vrot.lane.b32.xlu1 %v7056_v22, %s6847_s18 }
  0x7c   :  { %v556_v36 = vpop.permute.xlu1 %555  ;;  %v554_v37 = vpop.permute.xlu0 %553  ;;  %6531 = vmatmul.mubr.msk.f32.vlgmr.msra.gmra.mrb[6].mxu0 %vm51_vm1, %v6528_v35 }
  0x7d   :  { %v571_v38 = vsel %vm567_vm3, %v552_v31, %v554_v37  ;;  %809 = vmatprep.mubr.f32.mxu0 %v6844_v2  ;;  %v572_v44 = vsel %vm567_vm3, %v554_v37, %v556_v36 }
  0x7e   :  { %4237 = vrot.lane.b32.xlu0 %v7061_v23, %s6847_s18  ;;  %6532 = vmatprep.subr.msk.mxu1 %vm55_vm0, %v571_v38 }
  0x7f   :  { %6533 = vmatpush1.msk.msra.mxu1 %vm55_vm0, %v570_v39  ;;  %4239 = vrot.lane.b32.xlu1 %v7069_v24, %s6847_s18 }
  0x80   :  { %v560_v40 = vpop.permute.xlu1 %559  ;;  %v558_v41 = vpop.permute.xlu0 %557  ;;  %6534 = vmatmul.mubr.msk.f32.vlgmr.msra.gmra.mrb[6].mxu1 %vm51_vm1, %v6528_v35 }
  0x81   :  { %v573_v43 = vsel %vm567_vm3, %v556_v36, %v558_v41  ;;  %880 = vmatprep.mubr.f32.mxu1 %v6844_v2  ;;  %v574_v50 = vsel %vm567_vm3, %v558_v41, %v560_v40  ;;  %v6564_v36 = vld [vmem:[%s7770_s2 + $0x18] sm:$0xff] }
  0x82   :  { %4241 = vrot.lane.b32.xlu0 %v7098_v26, %s6847_s18  ;;  %6535 = vmatprep.subr.msk.mxu0 %vm55_vm0, %v573_v43 }
  0x83   :  { %6536 = vmatpush1.msk.msra.mxu0 %vm55_vm0, %v572_v44  ;;  %4243 = vrot.lane.b32.xlu1 %v7102_v27, %s6847_s18 }
  0x84   :  { %v564_v46 = vpop.permute.xlu1 %563  ;;  %v562_v47 = vpop.permute.xlu0 %561  ;;  %6537 = vmatmul.mubr.msk.f32.vlgmr.msra.gmra.mrb[8].mxu0 %vm51_vm1, %v6528_v35 }
  0x85   :  { %v575_v49 = vsel %vm567_vm3, %v560_v40, %v562_v47  ;;  %951 = vmatprep.mubr.f32.mxu0 %v6844_v2  ;;  %v576_v54 = vsel %vm567_vm3, %v562_v47, %v564_v46 }
  0x86   :  { %4245 = vrot.lane.b32.xlu0 %v4213_v45, %s6847_s18  ;;  %6538 = vmatprep.subr.msk.mxu1 %vm55_vm0, %v575_v49 }
  0x87   :  { %6539 = vmatpush1.msk.msra.mxu1 %vm55_vm0, %v574_v50  ;;  %4742 = vperm.xlu1 %6802, %v26_v48  }
  0x88   :  { %v1083_v51 = vpop.permute.xlu1 %1082  ;;  %v566_v52 = vpop.permute.xlu0 %565  ;;  %6732 = vmatprep.subr.mxu1 %v6844_v2  ;;  %6540 = vmatmul.mubr.msk.f32.vlgmr.msra.gmra.mrb[8].mxu1 %vm51_vm1, %v6528_v35 }
  0x89   :  { %v577_v53 = vsel %vm567_vm3, %v564_v46, %v566_v52  ;;  %6733 = vmatpush3.msk.msra.mxu1 %vm55_vm0, %v566_v52  ;;  %6734 = vmatprep.mubr.msk.f32.mxu1 %vm6846_vm2, %v6844_v2 }
  0x8a   :  { %6541 = vmatprep.subr.msk.mxu0 %vm55_vm0, %v577_v53 }
  0x8b   :  { %6542 = vmatpush1.msk.msra.mxu0 %vm55_vm0, %v576_v54 }
  0x8c   :  { %v1081_v55 = vpop.permute.xlu1 %1080  ;;  %v1085_v56 = vpop.permute.xlu0 %1084  ;;  %6543 = vmatmul.mubr.msk.f32.vlgmr.msra.gmra.mrb[10].mxu0 %vm51_vm1, %v6528_v35  ;;  %6735 = vmatmul.mubr.msk.f32.vlgmr.msra.gmra.mrb[10].mxu1 %vm51_vm1, %v6528_v35 }
  0x8d   :  { %v1102_v57 = vsel %vm513_vm4, %v1081_v55, %v1083_v51  ;;  %v1103_v58 = vsel %vm513_vm4, %v1083_v51, %v1085_v56  ;;  %1201 = vmatprep.mubr.f32.mxu0 %v6844_v2  ;;  %1272 = vmatprep.mubr.f32.mxu1 %v6844_v2 }
  0x8e   :  { %6547 = vmatprep.subr.msk.mxu0 %vm55_vm0, %v1103_v58 }
  0x8f   :  { %6548 = vmatpush1.msk.msra.mxu0 %vm55_vm0, %v1102_v57 }
  0x90   :  { %v1089_v60 = vpop.permute.xlu1 %1088  ;;  %v1087_v61 = vpop.permute.xlu0 %1086  ;;  %6549 = vmatmul.mubr.msk.f32.vlgmr.msra.gmra.mrb[12].mxu0 %vm51_vm1, %v6546_v59 }
  0x91   :  { %v1104_v62 = vsel %vm513_vm4, %v1085_v56, %v1087_v61  ;;  %v1105_v63 = vsel %vm513_vm4, %v1087_v61, %v1089_v60  ;;  %1343 = vmatprep.mubr.f32.mxu0 %v6844_v2 }
  0x92   :  { %6550 = vmatprep.subr.msk.mxu1 %vm55_vm0, %v1105_v63 }
  0x93   :  { %6551 = vmatpush1.msk.msra.mxu1 %vm55_vm0, %v1104_v62 }
  0x94   :  { %v1093_v1 = vpop.permute.xlu1 %1092  ;;  %v1091_v4 = vpop.permute.xlu0 %1090  ;;  %6552 = vmatmul.mubr.msk.f32.vlgmr.msra.gmra.mrb[12].mxu1 %vm51_vm1, %v6546_v59 }
  0x95   :  { %v1106_v9 = vsel %vm513_vm4, %v1089_v60, %v1091_v4  ;;  %v1107_v12 = vsel %vm513_vm4, %v1091_v4, %v1093_v1  ;;  %1414 = vmatprep.mubr.f32.mxu1 %v6844_v2 }
  0x96   :  { %6553 = vmatprep.subr.msk.mxu0 %vm55_vm0, %v1107_v12 }
  0x97   :  { %6554 = vmatpush1.msk.msra.mxu0 %vm55_vm0, %v1106_v9 }
  0x98   :  { %v1097_v13 = vpop.permute.xlu1 %1096  ;;  %v1095_v14 = vpop.permute.xlu0 %1094  ;;  %6555 = vmatmul.mubr.msk.f32.vlgmr.msra.gmra.mrb[14].mxu0 %vm51_vm1, %v6546_v59 }
  0x99   :  { %v1108_v15 = vsel %vm513_vm4, %v1093_v1, %v1095_v14  ;;  %v1109_v16 = vsel %vm513_vm4, %v1095_v14, %v1097_v13  ;;  %1485 = vmatprep.mubr.f32.mxu0 %v6844_v2 }
  0x9a   :  { %6556 = vmatprep.subr.msk.mxu1 %vm55_vm0, %v1109_v16 }
  0x9b   :  { %6557 = vmatpush1.msk.msra.mxu1 %vm55_vm0, %v1108_v15 }
  0x9c   :  { %v1101_v25 = vpop.permute.xlu1 %1100  ;;  %v1099_v28 = vpop.permute.xlu0 %1098  ;;  %6737 = vmatprep.subr.mxu1 %v6844_v2  ;;  %6558 = vmatmul.mubr.msk.f32.vlgmr.msra.gmra.mrb[14].mxu1 %vm51_vm1, %v6546_v59 }
  0x9d   :  { %v1110_v29 = vsel %vm513_vm4, %v1097_v13, %v1099_v28  ;;  %v1111_v30 = vsel %vm513_vm4, %v1099_v28, %v1101_v25  ;;  %6738 = vmatpush3.msk.msra.mxu1 %vm55_vm0, %v1101_v25  ;;  %6739 = vmatprep.mubr.msk.f32.mxu1 %vm6846_vm2, %v6844_v2 }
  0x9e   :  { %6559 = vmatprep.subr.msk.mxu0 %vm55_vm0, %v1111_v30 }
  0x9f   :  { %6560 = vmatpush1.msk.msra.mxu0 %vm55_vm0, %v1110_v29 }
  0xa0   :  { %v1619_v31 = vpop.permute.xlu1 %1618  ;;  %v1617_v32 = vpop.permute.xlu0 %1616  ;;  %6561 = vmatmul.mubr.msk.f32.vlgmr.msra.gmra.mrb[16].mxu0 %vm51_vm1, %v6546_v59  ;;  %6740 = vmatmul.mubr.msk.f32.vlgmr.msra.gmra.mrb[16].mxu1 %vm51_vm1, %v6546_v59  ;;  %v6582_v59 = vld [vmem:[%s7770_s2 + $0x20] sm:$0xff] }
  0xa1   :  { %v1637_v33 = vsel %vm513_vm4, %v1617_v32, %v1619_v31  ;;  %1735 = vmatprep.mubr.f32.mxu0 %v6844_v2  ;;  %1806 = vmatprep.mubr.f32.mxu1 %v6844_v2 }
  0xa2   :  { %6565 = vmatprep.subr.msk.mxu0 %vm55_vm0, %v1637_v33  ;;  %v2674_v33 = vld [vmem:[%s7769_s0 + $0x28] sm:$0xff] }
  0xa4   :  { %v1621_v34 = vpop.permute.xlu1 %1620  ;;  %v1615_v35 = vpop.permute.xlu0 %1614 }
  0xa5   :  { %v1636_v37 = vsel %vm513_vm4, %v1615_v35, %v1617_v32  ;;  %v1638_v41 = vsel %vm513_vm4, %v1619_v31, %v1621_v34  ;;  %v6600_v35 = vld [vmem:[%s7770_s2 + $0x28] sm:$0xff] }
  0xa6   :  { %6566 = vmatpush1.msk.msra.mxu0 %vm55_vm0, %v1636_v37 }
  0xa7   :  { %6567 = vmatmul.mubr.msk.f32.vlgmr.msra.gmra.mrb[18].mxu0 %vm51_vm1, %v6564_v36 }
  0xa8   :  { %v1625_v38 = vpop.permute.xlu1 %1624  ;;  %v1623_v39 = vpop.permute.xlu0 %1622  ;;  %1877 = vmatprep.mubr.f32.mxu0 %v6844_v2 }
  0xa9   :  { %v1639_v40 = vsel %vm513_vm4, %v1621_v34, %v1623_v39  ;;  %v1640_v46 = vsel %vm513_vm4, %v1623_v39, %v1625_v38 }
  0xaa   :  { %6568 = vmatprep.subr.msk.mxu1 %vm55_vm0, %v1639_v40 }
  0xab   :  { %6569 = vmatpush1.msk.msra.mxu1 %vm55_vm0, %v1638_v41 }
  0xac   :  { %v1629_v43 = vpop.permute.xlu1 %1628  ;;  %v1627_v44 = vpop.permute.xlu0 %1626  ;;  %6570 = vmatmul.mubr.msk.f32.vlgmr.msra.gmra.mrb[18].mxu1 %vm51_vm1, %v6564_v36 }
  0xad   :  { %v1641_v45 = vsel %vm513_vm4, %v1625_v38, %v1627_v44  ;;  %1948 = vmatprep.mubr.f32.mxu1 %v6844_v2  ;;  %v1642_v50 = vsel %vm513_vm4, %v1627_v44, %v1629_v43 }
  0xae   :  { %6571 = vmatprep.subr.msk.mxu0 %vm55_vm0, %v1641_v45 }
  0xaf   :  { %6572 = vmatpush1.msk.msra.mxu0 %vm55_vm0, %v1640_v46 }
  0xb0   :  { %v1633_v47 = vpop.permute.xlu1 %1632  ;;  %v1631_v48 = vpop.permute.xlu0 %1630  ;;  %6573 = vmatmul.mubr.msk.f32.vlgmr.msra.gmra.mrb[20].mxu0 %vm51_vm1, %v6564_v36 }
  0xb1   :  { %v1643_v49 = vsel %vm513_vm4, %v1629_v43, %v1631_v48  ;;  %2019 = vmatprep.mubr.f32.mxu0 %v6844_v2  ;;  %v1644_v54 = vsel %vm513_vm4, %v1631_v48, %v1633_v47 }
  0xb2   :  { %6574 = vmatprep.subr.msk.mxu1 %vm55_vm0, %v1643_v49  ;;  %v6636_v49 = vld [vmem:[%s7770_s2 + $0x38] sm:$0xff] }
  0xb3   :  { %6575 = vmatpush1.msk.msra.mxu1 %vm55_vm0, %v1642_v50 }
  0xb4   :  { %v2152_v51 = vpop.permute.xlu1 %2151  ;;  %v1635_v52 = vpop.permute.xlu0 %1634  ;;  %6742 = vmatprep.subr.mxu1 %v6844_v2  ;;  %6576 = vmatmul.mubr.msk.f32.vlgmr.msra.gmra.mrb[20].mxu1 %vm51_vm1, %v6564_v36 }
  0xb5   :  { %v1645_v53 = vsel %vm513_vm4, %v1633_v47, %v1635_v52  ;;  %6743 = vmatpush3.msk.msra.mxu1 %vm55_vm0, %v1635_v52  ;;  %6744 = vmatprep.mubr.msk.f32.mxu1 %vm6846_vm2, %v6844_v2 }
  0xb6   :  { %6577 = vmatprep.subr.msk.mxu0 %vm55_vm0, %v1645_v53 }
  0xb7   :  { %6578 = vmatpush1.msk.msra.mxu0 %vm55_vm0, %v1644_v54 }
  0xb8   :  { %v2150_v55 = vpop.permute.xlu1 %2149  ;;  %v2154_v56 = vpop.permute.xlu0 %2153  ;;  %6579 = vmatmul.mubr.msk.f32.vlgmr.msra.gmra.mrb[22].mxu0 %vm51_vm1, %v6564_v36  ;;  %6745 = vmatmul.mubr.msk.f32.vlgmr.msra.gmra.mrb[22].mxu1 %vm51_vm1, %v6564_v36 }
  0xb9   :  { %v2174_v57 = vsel %vm2173_vm5, %v2150_v55, %v2152_v51  ;;  %v2175_v58 = vsel %vm2173_vm5, %v2152_v51, %v2154_v56  ;;  %2274 = vmatprep.mubr.f32.mxu0 %v6844_v2  ;;  %2345 = vmatprep.mubr.f32.mxu1 %v6844_v2 }
  0xba   :  { %6583 = vmatprep.subr.msk.mxu0 %vm55_vm0, %v2175_v58 }
  0xbb   :  { %6584 = vmatpush1.msk.msra.mxu0 %vm55_vm0, %v2174_v57 }
  0xbc   :  { %v2158_v60 = vpop.permute.xlu1 %2157  ;;  %v2156_v61 = vpop.permute.xlu0 %2155  ;;  %6585 = vmatmul.mubr.msk.f32.vlgmr.msra.gmra.mrb[24].mxu0 %vm51_vm1, %v6582_v59 }
  0xbd   :  { %v2176_v62 = vsel %vm2173_vm5, %v2154_v56, %v2156_v61  ;;  %v2177_v63 = vsel %vm2173_vm5, %v2156_v61, %v2158_v60  ;;  %2416 = vmatprep.mubr.f32.mxu0 %v6844_v2 }
  0xbe   :  { %6586 = vmatprep.subr.msk.mxu1 %vm55_vm0, %v2177_v63 }
  0xbf   :  { %6587 = vmatpush1.msk.msra.mxu1 %vm55_vm0, %v2176_v62 }
  0xc0   :  { %v2162_v1 = vpop.permute.xlu1 %2161  ;;  %v2160_v4 = vpop.permute.xlu0 %2159  ;;  %6588 = vmatmul.mubr.msk.f32.vlgmr.msra.gmra.mrb[24].mxu1 %vm51_vm1, %v6582_v59 }
  0xc1   :  { %v2178_v9 = vsel %vm2173_vm5, %v2158_v60, %v2160_v4  ;;  %v2179_v12 = vsel %vm2173_vm5, %v2160_v4, %v2162_v1  ;;  %2487 = vmatprep.mubr.f32.mxu1 %v6844_v2 }
  0xc2   :  { %6589 = vmatprep.subr.msk.mxu0 %vm55_vm0, %v2179_v12 }
  0xc3   :  { %6590 = vmatpush1.msk.msra.mxu0 %vm55_vm0, %v2178_v9 }
  0xc4   :  { %v2166_v13 = vpop.permute.xlu1 %2165  ;;  %v2164_v14 = vpop.permute.xlu0 %2163  ;;  %6591 = vmatmul.mubr.msk.f32.vlgmr.msra.gmra.mrb[26].mxu0 %vm51_vm1, %v6582_v59 }
  0xc5   :  { %v2180_v15 = vsel %vm2173_vm5, %v2162_v1, %v2164_v14  ;;  %v2181_v16 = vsel %vm2173_vm5, %v2164_v14, %v2166_v13  ;;  %2558 = vmatprep.mubr.f32.mxu0 %v6844_v2 }
  0xc6   :  { %6592 = vmatprep.subr.msk.mxu1 %vm55_vm0, %v2181_v16 }
  0xc7   :  { %6593 = vmatpush1.msk.msra.mxu1 %vm55_vm0, %v2180_v15 }
  0xc8   :  { %v2170_v25 = vpop.permute.xlu1 %2169  ;;  %v2168_v28 = vpop.permute.xlu0 %2167  ;;  %6594 = vmatmul.mubr.msk.f32.vlgmr.msra.gmra.mrb[26].mxu1 %vm51_vm1, %v6582_v59  ;;  %6747 = vmatprep.subr.mxu1 %v6844_v2 }
  0xc9   :  { %v2182_v29 = vsel %vm2173_vm5, %v2166_v13, %v2168_v28  ;;  %v2183_v30 = vsel %vm2173_vm5, %v2168_v28, %v2170_v25  ;;  %6749 = vmatprep.mubr.msk.f32.mxu1 %vm6846_vm2, %v6844_v2  ;;  %v6654_v13 = vld [vmem:[%s7770_s2 + $0x40] sm:$0xff] }
  0xca   :  { %6595 = vmatprep.subr.msk.mxu0 %vm55_vm0, %v2183_v30 }
  0xcb   :  { %6596 = vmatpush1.msk.msra.mxu0 %vm55_vm0, %v2182_v29 }
  0xcc   :  { %v2172_v31 = vpop.permute.xlu0 %2171  ;;  %6597 = vmatmul.mubr.msk.f32.vlgmr.msra.gmra.mrb[28].mxu0 %vm51_vm1, %v6582_v59  ;;  %6601 = vmatprep.subr.msk.mxu0 %vm55_vm0, %v6908_v3  ;;  %v7313_v32 = vpop.permute.xlu1 %3693  ;;  %v2686_v3 = vcombine.high %v2674_v33, %v2674_v33 }
  0xcd   :  { %v2184_v34 = vsel %vm2173_vm5, %v2170_v25, %v2172_v31  ;;  %6602 = vmatpush1.msk.msra.mxu0 %vm55_vm0, %v6897_v0  ;;  %2776 = vmatprep.mubr.f32.mxu0 %v6844_v2 }
  0xce   :  { %6748 = vmatpush3.msk.msra.mxu1 %vm55_vm0, %v2184_v34  ;;  %6607 = vmatprep.subr.msk.mxu0 %vm55_vm0, %v6954_v11  ;;  %v6618_v11 = vld [vmem:[%s7770_s2 + $0x30] sm:$0xff] }
  0xcf   :  { %6750 = vmatmul.mubr.msk.f32.vlgmr.msra.gmra.mrb[28].mxu1 %vm51_vm1, %v6582_v59  ;;  %6604 = vmatprep.subr.msk.mxu1 %vm55_vm0, %v6926_v7 }
  0xd0   :  { %v7331_v36 = vpop.permute.xlu0 %3695  ;;  %6603 = vmatmul.mubr.msk.f32.vlgmr.msra.gmra.mrb[30].mxu0 %vm51_vm1, %v6600_v35  ;;  %6605 = vmatpush1.msk.msra.mxu1 %vm55_vm0, %v6914_v5  ;;  %v3692_v0 = vpop.permute.xlu1 %3691 }
  0xd1   :  { %2847 = vmatprep.mubr.f32.mxu1 %v6844_v2  ;;  %6608 = vmatpush1.msk.msra.mxu0 %vm55_vm0, %v6937_v8  ;;  %v2675_v8 = vld [vmem:[%s7769_s0 + $0x30] sm:$0xf]  ;;  %v3713_v44 = vsel %vm567_vm3, %v3692_v0, %v7313_v32 }
  0xd2   :  { %2918 = vmatprep.mubr.f32.mxu0 %v6844_v2  ;;  %6610 = vmatprep.subr.msk.mxu1 %vm55_vm0, %v6944_v10 }
  0xd3   :  { %6606 = vmatmul.mubr.msk.f32.vlgmr.msra.gmra.mrb[30].mxu1 %vm51_vm1, %v6600_v35  ;;  %6613 = vmatprep.subr.msk.mxu0 %vm55_vm0, %v2686_v3 }
  0xd4   :  { %v7344_v7 = vpop.permute.xlu0 %3697  ;;  %6609 = vmatmul.mubr.msk.f32.vlgmr.msra.gmra.mrb[32].mxu0 %vm51_vm1, %v6600_v35  ;;  %6611 = vmatpush1.msk.msra.mxu1 %vm55_vm0, %v6919_v6  ;;  %v7349_v5 = vpop.permute.xlu1 %3699 }
  0xd5   :  { %2989 = vmatprep.mubr.f32.mxu1 %v6844_v2  ;;  %6614 = vmatpush1.msk.msra.mxu0 %vm55_vm0, %v2674_v33  ;;  %v3716_v45 = vsel %vm567_vm3, %v7344_v7, %v7349_v5  ;;  %v3715_v51 = vsel %vm567_vm3, %v7331_v36, %v7344_v7 }
  0xd6   :  { %3060 = vmatprep.mubr.f32.mxu0 %v6844_v2  ;;  %6752 = vmatprep.subr.mxu1 %v6844_v2 }
  0xd7   :  { %6612 = vmatmul.mubr.msk.f32.vlgmr.msra.gmra.mrb[32].mxu1 %vm51_vm1, %v6600_v35  ;;  %6619 = vmatprep.subr.msk.mxu0 %vm55_vm0, %v7028_v18 }
  0xd8   :  { %v7361_v6 = vpop.permute.xlu0 %3701  ;;  %6615 = vmatmul.mubr.msk.f32.vlgmr.msra.gmra.mrb[34].mxu0 %vm51_vm1, %v6600_v35  ;;  %6753 = vmatpush3.msk.msra.mxu1 %vm55_vm0, %v2675_v8  ;;  %v7365_v10 = vpop.permute.xlu1 %3703 }
  0xd9   :  { %6754 = vmatprep.mubr.msk.f32.mxu1 %vm6846_vm2, %v6844_v2  ;;  %6620 = vmatpush1.msk.msra.mxu0 %vm55_vm0, %v7024_v17  ;;  %v3718_v48 = vsel %vm567_vm3, %v7361_v6, %v7365_v10  ;;  %v3717_v54 = vsel %vm567_vm3, %v7349_v5, %v7361_v6 }
  0xda   :  { %3278 = vmatprep.mubr.f32.mxu0 %v6844_v2  ;;  %6622 = vmatprep.subr.msk.mxu1 %vm55_vm0, %v7043_v20  ;;  %v7377_v18 = vpop.f32.mrb[0].mxu0 }
  0xdb   :  { %6755 = vmatmul.mubr.msk.f32.vlgmr.msra.gmra.mrb[34].mxu1 %vm51_vm1, %v6600_v35  ;;  %6625 = vmatprep.subr.msk.mxu0 %vm55_vm0, %v7056_v22  ;;  %v7382_v37 = vpop.f32.mrb[1].mxu0 }
  0xdc   :  { %v3706_v38 = vpop.permute.xlu0 %3705  ;;  %6621 = vmatmul.mubr.msk.f32.vlgmr.msra.gmra.mrb[36].mxu0 %vm51_vm1, %v6618_v11  ;;  %6623 = vmatpush1.msk.msra.mxu1 %vm55_vm0, %v7036_v19  ;;  %v3708_v17 = vpop.permute.xlu1 %3707 }
  0xdd   :  { %3349 = vmatprep.mubr.f32.mxu1 %v6844_v2  ;;  %6626 = vmatpush1.msk.msra.mxu0 %vm55_vm0, %v7048_v21  ;;  %v7390_v20 = vpop.f32.mrb[0].mxu1  ;;  %v3720_v55 = vsel %vm567_vm3, %v3706_v38, %v3708_v17  ;;  %v3719_v58 = vsel %vm567_vm3, %v7365_v10, %v3706_v38 }
  0xde   :  { %3420 = vmatprep.mubr.f32.mxu0 %v6844_v2  ;;  %6631 = vmatprep.subr.msk.mxu0 %vm55_vm0, %v7102_v27  ;;  %v7395_v22 = vpop.f32.mrb[1].mxu1  ;;  %v7397_v39 = vpop.f32.mrb[2].mxu0  ;;  %v3714_v27 = vsel %vm567_vm3, %v7313_v32, %v7331_v36 }
  0xdf   :  { %6624 = vmatmul.mubr.msk.f32.vlgmr.msra.gmra.mrb[36].mxu1 %vm51_vm1, %v6618_v11  ;;  %6628 = vmatprep.subr.msk.mxu1 %vm55_vm0, %v7069_v24  ;;  %v7402_v19 = vpop.f32.mrb[3].mxu0  ;;  %v3177_v24 = vld [vmem:[%s7769_s0 + $0x34] sm:$0xf] }
  0xe0   :  { %v3710_v40 = vpop.permute.xlu0 %3709  ;;  %6627 = vmatmul.mubr.msk.f32.vlgmr.msra.gmra.mrb[38].mxu0 %vm51_vm1, %v6618_v11  ;;  %6629 = vmatpush1.msk.msra.mxu1 %vm55_vm0, %v7061_v23  ;;  %v3712_v21 = vpop.permute.xlu1 %3711 }
  0xe1   :  { %6632 = vmatpush1.msk.msra.mxu0 %vm55_vm0, %v7098_v26  ;;  %3491 = vmatprep.mubr.f32.mxu1 %v6844_v2  ;;  %v3722_v52 = vsel %vm567_vm3, %v3710_v40, %v3712_v21  ;;  %v3721_v60 = vsel %vm567_vm3, %v3708_v17, %v3710_v40 }
  0xe2   :  { %6637 = vmatprep.subr.msk.mxu0 %vm55_vm0, %v3714_v27  ;;  %6757 = vmatprep.subr.mxu1 %v6844_v2  ;;  %v7418_v41 = vpop.f32.mrb[2].mxu1  ;;  %v7420_v23 = vpop.f32.mrb[4].mxu0 }
  0xe3   :  { %6630 = vmatmul.mubr.msk.f32.vlgmr.msra.gmra.mrb[38].mxu1 %vm51_vm1, %v6618_v11  ;;  %3562 = vmatprep.mubr.f32.mxu0 %v6844_v2  ;;  %v7424_v43 = vpop.f32.mrb[3].mxu1  ;;  %v7426_v26 = vpop.f32.mrb[5].mxu0 }
  0xe4   :  { %6758 = vmatpush3.msk.msra.mxu1 %vm55_vm0, %v3177_v24  ;;  %v4228_v46 = vpop.permute.xlu0 %4227  ;;  %6633 = vmatmul.mubr.msk.f32.vlgmr.msra.gmra.mrb[40].mxu0 %vm51_vm1, %v6618_v11  ;;  %v4230_v47 = vpop.permute.xlu1 %4229 }
  0xe5   :  { %6638 = vmatpush1.msk.msra.mxu0 %vm55_vm0, %v3713_v44  ;;  %6640 = vmatprep.subr.msk.mxu1 %vm55_vm0, %v3716_v45  ;;  %v4248_v59 = vsel %vm513_vm4, %v4228_v46, %v4230_v47 }
  0xe6   :  { %6643 = vmatprep.subr.msk.mxu0 %vm55_vm0, %v3718_v48  ;;  %6759 = vmatprep.mubr.msk.f32.mxu1 %vm6846_vm2, %v6844_v2  ;;  %v499_v50 = vpop.f32.mrb[4].mxu1 }
  0xe7   :  { %6760 = vmatmul.mubr.msk.f32.vlgmr.msra.gmra.mrb[40].mxu1 %vm51_vm1, %v6618_v11  ;;  %3812 = vmatprep.mubr.f32.mxu0 %v6844_v2  ;;  %514 = vst.msk [vmem:[#allocation2 + $0x50] sm:$0xff] %vm513_vm4, %v499_v50  ;;  %v6731_v53 = vpop.f32.mrb[5].mxu1 }
  0xe8   :  { %6641 = vmatpush1.msk.msra.mxu1 %vm55_vm0, %v3715_v51  ;;  %v4226_v56 = vpop.permute.xlu0 %4225  ;;  %6639 = vmatmul.mubr.msk.f32.vlgmr.msra.gmra.mrb[42].mxu0 %vm51_vm1, %v6636_v49  ;;  %v4232_v57 = vpop.permute.xlu1 %4231 }
  0xe9   :  { %6644 = vmatpush1.msk.msra.mxu0 %vm55_vm0, %v3717_v54  ;;  %6646 = vmatprep.subr.msk.mxu1 %vm55_vm0, %v3720_v55  ;;  %v4247_v1 = vsel %vm513_vm4, %v4226_v56, %v4228_v46  ;;  %v4249_v15 = vsel %vm513_vm4, %v4230_v47, %v4232_v57 }
  0xea   :  { %6649 = vmatprep.subr.msk.mxu0 %vm55_vm0, %v3722_v52  ;;  %3883 = vmatprep.mubr.f32.mxu1 %v6844_v2 }
  0xeb   :  { %6642 = vmatmul.mubr.msk.f32.vlgmr.msra.gmra.mrb[42].mxu1 %vm51_vm1, %v6636_v49  ;;  %3954 = vmatprep.mubr.f32.mxu0 %v6844_v2 }
  0xec   :  { %6647 = vmatpush1.msk.msra.mxu1 %vm55_vm0, %v3719_v58  ;;  %v4234_v61 = vpop.permute.xlu0 %4233  ;;  %6645 = vmatmul.mubr.msk.f32.vlgmr.msra.gmra.mrb[44].mxu0 %vm51_vm1, %v6636_v49 }
  0xed   :  { %6650 = vmatpush1.msk.msra.mxu0 %vm55_vm0, %v3721_v60  ;;  %4025 = vmatprep.mubr.f32.mxu1 %v6844_v2  ;;  %v4236_v62 = vpop.permute.xlu1 %4235  ;;  %v4250_v63 = vsel %vm513_vm4, %v4232_v57, %v4234_v61 }
  0xee   :  { %6655 = vmatprep.subr.msk.mxu0 %vm55_vm0, %v4248_v59  ;;  %6762 = vmatprep.subr.mxu1 %v6844_v2  ;;  %v4251_v14 = vsel %vm513_vm4, %v4234_v61, %v4236_v62 }
  0xef   :  { %6648 = vmatmul.mubr.msk.f32.vlgmr.msra.gmra.mrb[44].mxu1 %vm51_vm1, %v6636_v49  ;;  %4096 = vmatprep.mubr.f32.mxu0 %v6844_v2 }
  0xf0   :  { %6763 = vmatpush3.msk.msra.mxu1 %vm55_vm0, %v3712_v21  ;;  %v4238_v4 = vpop.permute.xlu0 %4237  ;;  %6651 = vmatmul.mubr.msk.f32.vlgmr.msra.gmra.mrb[46].mxu0 %vm51_vm1, %v6636_v49  ;;  %v525_v21 = vld [vmem:[#allocation2 + $0x50] sm:$0xff] }
  0xf1   :  { %v4252_v9 = vsel %vm513_vm4, %v4236_v62, %v4238_v4  ;;  %6656 = vmatpush1.msk.msra.mxu0 %vm55_vm0, %v4247_v1  ;;  %6764 = vmatprep.mubr.msk.f32.mxu1 %vm6846_vm2, %v6844_v2  ;;  %v4240_v12 = vpop.permute.xlu1 %4239 }
  0xf2   :  { %6658 = vmatprep.subr.msk.mxu1 %vm55_vm0, %v4250_v63  ;;  %4346 = vmatprep.mubr.f32.mxu0 %v6844_v2  ;;  %v4253_v25 = vsel %vm513_vm4, %v4238_v4, %v4240_v12 }
  0xf3   :  { %6765 = vmatmul.mubr.msk.f32.vlgmr.msra.gmra.mrb[46].mxu1 %vm51_vm1, %v6636_v49  ;;  %6661 = vmatprep.subr.msk.mxu0 %vm55_vm0, %v4252_v9 }
  0xf4   :  { %6659 = vmatpush1.msk.msra.mxu1 %vm55_vm0, %v4249_v15  ;;  %v4242_v16 = vpop.permute.xlu0 %4241  ;;  %6657 = vmatmul.mubr.msk.f32.vlgmr.msra.gmra.mrb[48].mxu0 %vm51_vm1, %v6654_v13 }
  0xf5   :  { %v4254_v28 = vsel %vm513_vm4, %v4240_v12, %v4242_v16  ;;  %6662 = vmatpush1.msk.msra.mxu0 %vm55_vm0, %v4251_v14  ;;  %4417 = vmatprep.mubr.f32.mxu1 %v6844_v2  ;;  %v4244_v29 = vpop.permute.xlu1 %4243 }
  0xf6   :  { %4488 = vmatprep.mubr.f32.mxu0 %v6844_v2  ;;  %6664 = vmatprep.subr.msk.mxu1 %vm55_vm0, %v4254_v28  ;;  %v4255_v30 = vsel %vm513_vm4, %v4242_v16, %v4244_v29 }
  0xf7   :  { %6660 = vmatmul.mubr.msk.f32.vlgmr.msra.gmra.mrb[48].mxu1 %vm51_vm1, %v6654_v13 }
  0xf8   :  { %v4246_v31 = vpop.permute.xlu0 %4245  ;;  %6663 = vmatmul.mubr.msk.f32.vlgmr.msra.gmra.mrb[50].mxu0 %vm51_vm1, %v6654_v13  ;;  %6665 = vmatpush1.msk.msra.mxu1 %vm55_vm0, %v4253_v25 }
  0xf9   :  { %v4256_v32 = vsel %vm513_vm4, %v4244_v29, %v4246_v31  ;;  %4559 = vmatprep.mubr.f32.mxu1 %v6844_v2  ;;  %4630 = vmatprep.mubr.f32.mxu0 %v6844_v2 }
  0xfa   :  { %6667 = vmatprep.subr.msk.mxu0 %vm55_vm0, %v4256_v32  ;;  %6767 = vmatprep.subr.mxu1 %v6844_v2 }
  0xfb   :  { %6666 = vmatmul.mubr.msk.f32.vlgmr.msra.gmra.mrb[50].mxu1 %vm51_vm1, %v6654_v13  ;;  %6668 = vmatpush1.msk.msra.mxu0 %vm55_vm0, %v4255_v30 }
  0xfc   :  { %6669 = vmatmul.mubr.msk.f32.vlgmr.msra.gmra.mrb[52].mxu0 %vm51_vm1, %v6654_v13  ;;  %6768 = vmatpush3.msk.msra.mxu1 %vm55_vm0, %v4246_v31 }
  0xfd   :  { %6769 = vmatprep.mubr.msk.f32.mxu1 %vm6846_vm2, %v6844_v2  ;;  %4859 = vmatprep.mubr.f32.mxu0 %v6844_v2 }
  0xff   :  { %6770 = vmatmul.mubr.msk.f32.vlgmr.msra.gmra.mrb[52].mxu1 %vm51_vm1, %v6654_v13 }
 0x100   :  { %4936 = vmatprep.mubr.f32.mxu1 %v6844_v2 }
 0x14f   :  { %v669_v33 = vpop.f32.mrb[6].mxu0 }
 0x150   :  { %v1028_v34 = vadd.f32 %v669_v33, %v7377_v18  ;;  %v671_v35 = vpop.f32.mrb[7].mxu0 }
 0x151   :  { %v1029_v3 = vadd.f32 %v671_v35, %v7382_v37 }
 0x153   :  { %v740_v36 = vpop.f32.mrb[6].mxu1 }
 0x154   :  { %v1030_v0 = vadd.f32 %v740_v36, %v7390_v20  ;;  %v742_v7 = vpop.f32.mrb[7].mxu1 }
 0x155   :  { %v1031_v5 = vadd.f32 %v742_v7, %v7395_v22 }
 0x157   :  { %v811_v8 = vpop.f32.mrb[8].mxu0 }
 0x158   :  { %v1032_v6 = vadd.f32 %v811_v8, %v7397_v39  ;;  %v813_v10 = vpop.f32.mrb[9].mxu0 }
 0x159   :  { %v1033_v11 = vadd.f32 %v813_v10, %v7402_v19 }
 0x15b   :  { %v882_v38 = vpop.f32.mrb[8].mxu1 }
 0x15c   :  { %v1034_v17 = vadd.f32 %v882_v38, %v7418_v41  ;;  %v884_v40 = vpop.f32.mrb[9].mxu1 }
 0x15d   :  { %v1035_v18 = vadd.f32 %v884_v40, %v7424_v43 }
 0x15f   :  { %v1024_v37 = vpop.f32.mrb[10].mxu1  ;;  %v953_v27 = vpop.f32.mrb[10].mxu0 }
 0x160   :  { %v1038_v24 = vadd.f32 %v1024_v37, %v525_v21  ;;  %v6736_v20 = vpop.f32.mrb[11].mxu1  ;;  %v1036_v44 = vadd.f32 %v953_v27, %v7420_v23  ;;  %v955_v22 = vpop.f32.mrb[11].mxu0 }
 0x161   :  { %v1037_v45 = vadd.f32 %v955_v22, %v7426_v26 }
 0x162   :  { %1049 = vst.msk [vmem:[#allocation2 + $0x50] sm:$0xff] %vm513_vm4, %v1038_v24 }
 0x163   :  { %v1203_v39 = vpop.f32.mrb[12].mxu0 }
 0x164   :  { %v1562_v19 = vadd.f32 %v1203_v39, %v1028_v34  ;;  %v1205_v46 = vpop.f32.mrb[13].mxu0 }
 0x165   :  { %v1563_v47 = vadd.f32 %v1205_v46, %v1029_v3 }
 0x167   :  { %v1274_v41 = vpop.f32.mrb[12].mxu1 }
 0x168   :  { %v1564_v48 = vadd.f32 %v1274_v41, %v1030_v0  ;;  %v1276_v49 = vpop.f32.mrb[13].mxu1 }
 0x169   :  { %v1565_v43 = vadd.f32 %v1276_v49, %v1031_v5  ;;  %v1060_v57 = vld [vmem:[#allocation2 + $0x50] sm:$0xff] }
 0x16b   :  { %v1345_v50 = vpop.f32.mrb[14].mxu0 }
 0x16c   :  { %v1566_v51 = vadd.f32 %v1345_v50, %v1032_v6  ;;  %v1347_v52 = vpop.f32.mrb[15].mxu0 }
 0x16d   :  { %v1567_v53 = vadd.f32 %v1347_v52, %v1033_v11 }
 0x16f   :  { %v1416_v54 = vpop.f32.mrb[14].mxu1 }
 0x170   :  { %v1568_v55 = vadd.f32 %v1416_v54, %v1034_v17  ;;  %v1418_v23 = vpop.f32.mrb[15].mxu1 }
 0x171   :  { %v1569_v56 = vadd.f32 %v1418_v23, %v1035_v18 }
 0x173   :  { %v1558_v26 = vpop.f32.mrb[16].mxu1  ;;  %v1487_v58 = vpop.f32.mrb[16].mxu0 }
 0x174   :  { %v1572_v59 = vadd.f32 %v1558_v26, %v1060_v57  ;;  %v6741_v60 = vpop.f32.mrb[17].mxu1  ;;  %v1570_v61 = vadd.f32 %v1487_v58, %v1036_v44  ;;  %v1489_v62 = vpop.f32.mrb[17].mxu0 }
 0x175   :  { %v1571_v63 = vadd.f32 %v1489_v62, %v1037_v45 }
 0x176   :  { %1583 = vst.msk [vmem:[#allocation2 + $0x50] sm:$0xff] %vm513_vm4, %v1572_v59 }
 0x17a   :  { %v1737_v1 = vpop.f32.mrb[18].mxu0 }
 0x17b   :  { %v2096_v4 = vadd.f32 %v1737_v1, %v1562_v19  ;;  %v1739_v9 = vpop.f32.mrb[19].mxu0 }
 0x17c   :  { %v2097_v12 = vadd.f32 %v1739_v9, %v1563_v47 }
 0x17d   :  { %v1594_v35 = vld [vmem:[#allocation2 + $0x50] sm:$0xff] }
 0x17f   :  { %v1808_v13 = vpop.f32.mrb[18].mxu1 }
 0x180   :  { %v2098_v14 = vadd.f32 %v1808_v13, %v1564_v48  ;;  %v1810_v15 = vpop.f32.mrb[19].mxu1 }
 0x181   :  { %v2099_v16 = vadd.f32 %v1810_v15, %v1565_v43 }
 0x183   :  { %v1879_v25 = vpop.f32.mrb[20].mxu0 }
 0x184   :  { %v2100_v28 = vadd.f32 %v1879_v25, %v1566_v51  ;;  %v1881_v29 = vpop.f32.mrb[21].mxu0 }
 0x185   :  { %v2101_v30 = vadd.f32 %v1881_v29, %v1567_v53 }
 0x187   :  { %v1950_v31 = vpop.f32.mrb[20].mxu1 }
 0x188   :  { %v2102_v32 = vadd.f32 %v1950_v31, %v1568_v55  ;;  %v1952_v33 = vpop.f32.mrb[21].mxu1 }
 0x189   :  { %v2103_v34 = vadd.f32 %v1952_v33, %v1569_v56 }
 0x18b   :  { %v2092_v3 = vpop.f32.mrb[22].mxu1  ;;  %v2021_v36 = vpop.f32.mrb[22].mxu0 }
 0x18c   :  { %v2106_v0 = vadd.f32 %v2092_v3, %v1594_v35  ;;  %v2104_v7 = vadd.f32 %v2021_v36, %v1570_v61  ;;  %v2023_v5 = vpop.f32.mrb[23].mxu0  ;;  %v6746_v8 = vpop.f32.mrb[23].mxu1 }
 0x18d   :  { %v2105_v6 = vadd.f32 %v2023_v5, %v1571_v63 }
 0x18e   :  { %2117 = vst.msk [vmem:[#allocation2 + $0x50] sm:$0xff] %vm513_vm4, %v2106_v0 }
 0x18f   :  { %v2276_v10 = vpop.f32.mrb[24].mxu0 }
 0x190   :  { %v2635_v11 = vadd.f32 %v2276_v10, %v2096_v4  ;;  %v2278_v38 = vpop.f32.mrb[25].mxu0 }
 0x191   :  { %v2636_v17 = vadd.f32 %v2278_v38, %v2097_v12 }
 0x193   :  { %v2347_v40 = vpop.f32.mrb[24].mxu1 }
 0x194   :  { %v2637_v18 = vadd.f32 %v2347_v40, %v2098_v14  ;;  %v2349_v21 = vpop.f32.mrb[25].mxu1 }
 0x195   :  { %v2638_v37 = vadd.f32 %v2349_v21, %v2099_v16  ;;  %v2128_v49 = vld [vmem:[#allocation2 + $0x50] sm:$0xff] }
 0x197   :  { %v2418_v27 = vpop.f32.mrb[26].mxu0 }
 0x198   :  { %v2639_v24 = vadd.f32 %v2418_v27, %v2100_v28  ;;  %v2420_v20 = vpop.f32.mrb[27].mxu0 }
 0x199   :  { %v2640_v44 = vadd.f32 %v2420_v20, %v2101_v30 }
 0x19b   :  { %v2489_v22 = vpop.f32.mrb[26].mxu1 }
 0x19c   :  { %v2641_v45 = vadd.f32 %v2489_v22, %v2102_v32  ;;  %v2491_v39 = vpop.f32.mrb[27].mxu1 }
 0x19d   :  { %v2642_v19 = vadd.f32 %v2491_v39, %v2103_v34 }
 0x19f   :  { %v2560_v46 = vpop.f32.mrb[28].mxu0 }
 0x1a0   :  { %v2643_v47 = vadd.f32 %v2560_v46, %v2104_v7  ;;  %v2562_v41 = vpop.f32.mrb[29].mxu0 }
 0x1a1   :  { %v2644_v48 = vadd.f32 %v2562_v41, %v2105_v6 }
 0x1a2   :  { %v2631_v43 = vpop.f32.mrb[28].mxu1 }
 0x1a3   :  { %v2645_v50 = vadd.f32 %v2631_v43, %v2128_v49  ;;  %v6751_v51 = vpop.f32.mrb[29].mxu1  ;;  %v2778_v52 = vpop.f32.mrb[30].mxu0 }
 0x1a4   :  { %v3137_v53 = vadd.f32 %v2778_v52, %v2635_v11  ;;  %v2780_v54 = vpop.f32.mrb[31].mxu0 }
 0x1a5   :  { %2656 = vst.msk [vmem:[#allocation2 + $0x50] sm:$0xff] %vm513_vm4, %v2645_v50  ;;  %v3138_v55 = vadd.f32 %v2780_v54, %v2636_v17 }
 0x1a6   :  { %v2849_v23 = vpop.f32.mrb[30].mxu1 }
 0x1a7   :  { %v3139_v56 = vadd.f32 %v2849_v23, %v2637_v18  ;;  %v2851_v57 = vpop.f32.mrb[31].mxu1  ;;  %v2920_v26 = vpop.f32.mrb[32].mxu0 }
 0x1a8   :  { %v3140_v58 = vadd.f32 %v2851_v57, %v2638_v37  ;;  %v3141_v59 = vadd.f32 %v2920_v26, %v2639_v24  ;;  %v2922_v60 = vpop.f32.mrb[33].mxu0 }
 0x1a9   :  { %v3142_v61 = vadd.f32 %v2922_v60, %v2640_v44 }
 0x1aa   :  { %v2991_v62 = vpop.f32.mrb[32].mxu1 }
 0x1ab   :  { %v3143_v63 = vadd.f32 %v2991_v62, %v2641_v45  ;;  %v2993_v1 = vpop.f32.mrb[33].mxu1  ;;  %v3062_v4 = vpop.f32.mrb[34].mxu0 }
 0x1ac   :  { %v3144_v9 = vadd.f32 %v2993_v1, %v2642_v19  ;;  %v3145_v12 = vadd.f32 %v3062_v4, %v2643_v47  ;;  %v3064_v13 = vpop.f32.mrb[35].mxu0  ;;  %v2667_v15 = vld [vmem:[#allocation2 + $0x50] sm:$0xff] }
 0x1ad   :  { %v3146_v14 = vadd.f32 %v3064_v13, %v2644_v48 }
 0x1ae   :  { %v3133_v16 = vpop.f32.mrb[34].mxu1 }
 0x1af   :  { %v3147_v25 = vadd.f32 %v3133_v16, %v2667_v15  ;;  %v6756_v28 = vpop.f32.mrb[35].mxu1  ;;  %v3280_v29 = vpop.f32.mrb[36].mxu0 }
 0x1b0   :  { %v3639_v30 = vadd.f32 %v3280_v29, %v3137_v53  ;;  %v3282_v31 = vpop.f32.mrb[37].mxu0 }
 0x1b1   :  { %3158 = vst.msk [vmem:[#allocation2 + $0x50] sm:$0xff] %vm513_vm4, %v3147_v25  ;;  %v3640_v32 = vadd.f32 %v3282_v31, %v3138_v55 }
 0x1b2   :  { %v3351_v33 = vpop.f32.mrb[36].mxu1 }
 0x1b3   :  { %v3641_v34 = vadd.f32 %v3351_v33, %v3139_v56  ;;  %v3353_v35 = vpop.f32.mrb[37].mxu1  ;;  %v3422_v3 = vpop.f32.mrb[38].mxu0 }
 0x1b4   :  { %v3642_v36 = vadd.f32 %v3353_v35, %v3140_v58  ;;  %v3643_v0 = vadd.f32 %v3422_v3, %v3141_v59  ;;  %v3424_v7 = vpop.f32.mrb[39].mxu0  ;;  %v7536_v58 = vpop.permute.xlu1 %4742  ;;  %v4778_v3 = vld [vmem:[%s7772_s3] sm:$0xff] }
 0x1b5   :  { %v3644_v5 = vadd.f32 %v3424_v7, %v3142_v61 }
 0x1b6   :  { %v3493_v8 = vpop.f32.mrb[38].mxu1 }
 0x1b7   :  { %v3645_v6 = vadd.f32 %v3493_v8, %v3143_v63  ;;  %v3495_v10 = vpop.f32.mrb[39].mxu1  ;;  %v3564_v11 = vpop.f32.mrb[40].mxu0 }
 0x1b8   :  { %v3646_v38 = vadd.f32 %v3495_v10, %v3144_v9  ;;  %v3647_v17 = vadd.f32 %v3564_v11, %v3145_v12  ;;  %v3566_v40 = vpop.f32.mrb[41].mxu0  ;;  %v3169_v21 = vld [vmem:[#allocation2 + $0x50] sm:$0xff] }
 0x1b9   :  { %v3648_v18 = vadd.f32 %v3566_v40, %v3146_v14 }
 0x1ba   :  { %v3635_v37 = vpop.f32.mrb[40].mxu1 }
 0x1bb   :  { %v3649_v27 = vadd.f32 %v3635_v37, %v3169_v21  ;;  %v6761_v24 = vpop.f32.mrb[41].mxu1  ;;  %v3814_v20 = vpop.f32.mrb[42].mxu0 }
 0x1bc   :  { %v4173_v44 = vadd.f32 %v3814_v20, %v3639_v30  ;;  %v3816_v22 = vpop.f32.mrb[43].mxu0 }
 0x1bd   :  { %3660 = vst.msk [vmem:[#allocation2 + $0x50] sm:$0xff] %vm513_vm4, %v3649_v27  ;;  %v4174_v45 = vadd.f32 %v3816_v22, %v3640_v32 }
 0x1be   :  { %v3885_v39 = vpop.f32.mrb[42].mxu1 }
 0x1bf   :  { %v4175_v19 = vadd.f32 %v3885_v39, %v3641_v34  ;;  %v3887_v46 = vpop.f32.mrb[43].mxu1  ;;  %v3956_v47 = vpop.f32.mrb[44].mxu0 }
 0x1c0   :  { %v4176_v41 = vadd.f32 %v3887_v46, %v3642_v36  ;;  %v4177_v48 = vadd.f32 %v3956_v47, %v3643_v0  ;;  %v3958_v49 = vpop.f32.mrb[45].mxu0  ;;  %v4779_v47 = vld [vmem:[%s7772_s3 + $0x8] sm:$0xff] }
 0x1c1   :  { %v4178_v43 = vadd.f32 %v3958_v49, %v3644_v5 }
 0x1c2   :  { %v4027_v50 = vpop.f32.mrb[44].mxu1 }
 0x1c3   :  { %v4179_v51 = vadd.f32 %v4027_v50, %v3645_v6  ;;  %v4029_v52 = vpop.f32.mrb[45].mxu1  ;;  %v4098_v53 = vpop.f32.mrb[46].mxu0  ;;  %v28_v50 = vld [vmem:[%s7771_s5 + $0x10] sm:$0xff] }
 0x1c4   :  { %v4180_v54 = vadd.f32 %v4029_v52, %v3646_v38  ;;  %v4181_v55 = vadd.f32 %v4098_v53, %v3647_v17  ;;  %v4100_v23 = vpop.f32.mrb[47].mxu0  ;;  %v3671_v57 = vld [vmem:[#allocation2 + $0x50] sm:$0xff] }
 0x1c5   :  { %v4182_v56 = vadd.f32 %v4100_v23, %v3648_v18  ;;  %v6680_v23 = vld [vmem:[%s7772_s3 + $0x10] sm:$0xff] }
 0x1c6   :  { %v4169_v26 = vpop.f32.mrb[46].mxu1 }
 0x1c7   :  { %v4183_v59 = vadd.f32 %v4169_v26, %v3671_v57  ;;  %v6766_v60 = vpop.f32.mrb[47].mxu1  ;;  %v4348_v61 = vpop.f32.mrb[48].mxu0 }
 0x1c8   :  { %v4707_v62 = vadd.f32 %v4348_v61, %v4173_v44  ;;  %v4350_v63 = vpop.f32.mrb[49].mxu0 }
 0x1c9   :  { %4194 = vst.msk [vmem:[#allocation2 + $0x50] sm:$0xff] %vm513_vm4, %v4183_v59  ;;  %v4708_v1 = vadd.f32 %v4350_v63, %v4174_v45 }
 0x1ca   :  { %v4419_v4 = vpop.f32.mrb[48].mxu1  ;;  %v4745_v9 = vadd.f32 %v7536_v58, %v4707_v62 }
 0x1cb   :  { %v4709_v12 = vadd.f32 %v4419_v4, %v4175_v19  ;;  %v4421_v13 = vpop.f32.mrb[49].mxu1  ;;  %v4490_v14 = vpop.f32.mrb[50].mxu0  ;;  %v4746_v15 = vadd.f32 %v7536_v58, %v4708_v1 }
 0x1cc   :  { %v4710_v16 = vadd.f32 %v4421_v13, %v4176_v41  ;;  %v4711_v25 = vadd.f32 %v4490_v14, %v4177_v48  ;;  %v4492_v28 = vpop.f32.mrb[51].mxu0  ;;  %v4756_v29 = vmax.f32 %v4745_v9, 0.0  ;;  %v6690_v13 = vld [vmem:[%s7772_s3 + $0x20] sm:$0xff]  ;;  %v6691_v14 = vld [vmem:[%s7772_s3 + $0x28] sm:$0xff] }
 0x1cd   :  { %v4712_v30 = vadd.f32 %v4492_v28, %v4178_v43  ;;  %v4747_v31 = vadd.f32 %v7536_v58, %v4709_v12  ;;  %v4757_v32 = vmax.f32 %v4746_v15, 0.0 }
 0x1ce   :  { %v4561_v33 = vpop.f32.mrb[50].mxu1  ;;  %v4748_v34 = vadd.f32 %v7536_v58, %v4710_v16  ;;  %v4749_v35 = vadd.f32 %v7536_v58, %v4711_v25 }
 0x1cf   :  { %v4713_v36 = vadd.f32 %v4561_v33, %v4179_v51  ;;  %v4563_v0 = vpop.f32.mrb[51].mxu1  ;;  %v4632_v7 = vpop.f32.mrb[52].mxu0  ;;  %v4750_v5 = vadd.f32 %v7536_v58, %v4712_v30  ;;  %v4758_v8 = vmax.f32 %v4747_v31, 0.0  ;;  %4795 = vmatprep.subr.mxu0 %v4757_v32  ;;  %v27_v51 = vld [vmem:[%s7771_s5 + $0x8] sm:$0xff] }
 0x1d0   :  { %v4714_v6 = vadd.f32 %v4563_v0, %v4180_v54  ;;  %v4715_v10 = vadd.f32 %v4632_v7, %v4181_v55  ;;  %v4634_v11 = vpop.f32.mrb[53].mxu0  ;;  %v7548_v38 = vmax.f32 %v4748_v34, 0.0  ;;  %v7550_v17 = vmax.f32 %v4749_v35, 0.0  ;;  %4796 = vmatpush1.msra.mxu0 %v4756_v29  ;;  %v4205_v24 = vld [vmem:[#allocation2 + $0x50] sm:$0xff] }
 0x1d1   :  { %v4716_v40 = vadd.f32 %v4634_v11, %v4182_v56  ;;  %v4751_v18 = vadd.f32 %v7536_v58, %v4713_v36  ;;  %v7553_v21 = vmax.f32 %v4750_v5, 0.0  ;;  %5156 = vrot.lane.b32.xlu0 %v4758_v8, %s6847_s18  ;;  %6672 = vmatmul.mubr.msk.f32.vlgmr.msra.gmra.mrb[54].mxu0 %vm4788_vm6, %v4778_v3 }
 0x1d2   :  { %v4752_v37 = vadd.f32 %v7536_v58, %v4714_v6  ;;  %v7559_v27 = vadd.f32 %v7536_v58, %v4715_v10  ;;  %v4703_v20 = vpop.f32.mrb[52].mxu1  ;;  %5158 = vrot.lane.b32.xlu1 %v7548_v38, %s6847_s18  ;;  %4872 = vmatprep.subr.mxu1 %v7548_v38 }
 0x1d3   :  { %v7565_v44 = vadd.f32 %v7536_v58, %v4716_v40  ;;  %v7567_v22 = vmax.f32 %v4751_v18, 0.0  ;;  %v4717_v45 = vadd.f32 %v4703_v20, %v4205_v24  ;;  %4873 = vmatpush1.msra.mxu1 %v4758_v8  ;;  %4949 = vmatprep.subr.mxu0 %v7553_v21  ;;  %v6771_v39 = vpop.f32.mrb[53].mxu1 }
 0x1d4   :  { %v7570_v19 = vmax.f32 %v4752_v37, 0.0  ;;  %v4764_v46 = vmax.f32 %v7559_v27, 0.0  ;;  %4950 = vmatpush1.msra.mxu0 %v7550_v17  ;;  %6674 = vmatmul.mubr.msk.f32.vlgmr.msra.gmra.mrb[54].mxu1 %vm4788_vm6, %v4778_v3 }
 0x1d5   :  { %v4765_v41 = vmax.f32 %v7565_v44, 0.0  ;;  %4728 = vst.msk [vmem:[#allocation2 + $0x50] sm:$0xff] %vm513_vm4, %v4717_v45  ;;  %5154 = vrot.lane.b32.xlu0 %v4757_v32, %s6847_s18  ;;  %4865 = vmatprep.mubr.f32.mxu0 %v6844_v2 }
 0x1d6   :  { %5026 = vmatprep.subr.mxu1 %v7570_v19  ;;  %5160 = vrot.lane.b32.xlu1 %v7550_v17, %s6847_s18 }
 0x1d7   :  { %5027 = vmatpush1.msra.mxu1 %v7567_v22  ;;  %6673 = vmatmul.mubr.msk.f32.gmra.mrb[56].mxu0 %vm4788_vm6, %v4779_v47 }
 0x1d8   :  { %5013 = vmatprep.mubr.f32.mxu0 %v6844_v2  ;;  %4942 = vmatprep.mubr.f32.mxu1 %v6844_v2 }
 0x1d9   :  { %5162 = vrot.lane.b32.xlu0 %v7553_v21, %s6847_s18  ;;  %6675 = vmatmul.mubr.msk.f32.gmra.mrb[56].mxu1 %vm4788_vm6, %v4779_v47 }
 0x1da   :  { %5164 = vrot.lane.b32.xlu1 %v7567_v22, %s6847_s18  ;;  %5090 = vmatprep.mubr.f32.mxu1 %v6844_v2 }
 0x1db   :  { %6676 = vmatmul.mubr.msk.f32.vlgmr.msra.gmra.mrb[58].mxu0 %vm4788_vm6, %v4778_v3 }
 0x1dc   :  { %v4739_v48 = vld [vmem:[#allocation2 + $0x50] sm:$0xff]  ;;  %5019 = vmatprep.mubr.f32.mxu0 %v6844_v2 }
 0x1dd   :  { %v4755_v49 = vadd.f32 %v7536_v58, %v4739_v48  ;;  %5166 = vrot.lane.b32.xlu0 %v7570_v19, %s6847_s18  ;;  %6678 = vmatmul.mubr.msk.f32.vlgmr.msra.gmra.mrb[58].mxu1 %vm4788_vm6, %v4778_v3  ;;  %v6681_v58 = vld [vmem:[%s7772_s3 + $0x18] sm:$0xff] }
 0x1de   :  { %5168 = vrot.lane.b32.xlu1 %v4764_v46, %s6847_s18  ;;  %5096 = vmatprep.mubr.f32.mxu1 %v6844_v2 }
 0x1df   :  { %v4766_v43 = vmax.f32 %v4755_v49, 0.0  ;;  %6677 = vmatmul.mubr.msk.f32.gmra.mrb[60].mxu0 %vm4788_vm6, %v4779_v47 }
 0x1e0   :  { %5255 = vmatprep.mubr.f32.mxu0 %v6844_v2 }
 0x1e1   :  { %4777 = vst.msk [vmem:[#allocation2 + $0x50] sm:$0xff] %vm513_vm4, %v4766_v43  ;;  %6679 = vmatmul.mubr.msk.f32.gmra.mrb[60].mxu1 %vm4788_vm6, %v4779_v47  ;;  %5922 = vperm.xlu0 %6803, %v27_v51  }
 0x1e2   :  { %5927 = vperm.xlu1 %6802, %v28_v50   ;;  %5332 = vmatprep.mubr.f32.mxu1 %v6844_v2 }
 0x1e8   :  { %v5557_v12 = vld [vmem:[#allocation2 + $0x50] sm:$0xff] }
 0x243   :  { %v5157_v52 = vpop.permute.xlu0 %5156 }
 0x244   :  { %v5159_v53 = vpop.permute.xlu1 %5158 }
 0x245   :  { %v5171_v54 = vsel %vm513_vm4, %v5157_v52, %v5159_v53 }
 0x246   :  { %5191 = vmatprep.subr.mxu0 %v5171_v54 }
 0x247   :  { %v5155_v55 = vpop.permute.xlu0 %5154 }
 0x248   :  { %v5170_v56 = vsel %vm513_vm4, %v5155_v55, %v5157_v52  ;;  %v5161_v57 = vpop.permute.xlu1 %5160 }
 0x249   :  { %5192 = vmatpush1.msra.mxu0 %v5170_v56  ;;  %v5172_v61 = vsel %vm513_vm4, %v5159_v53, %v5161_v57 }
 0x24a   :  { %6682 = vmatmul.mubr.msk.f32.vlgmr.msra.gmra.mrb[62].mxu0 %vm4788_vm6, %v6680_v23 }
 0x24b   :  { %v5163_v26 = vpop.permute.xlu0 %5162  ;;  %5261 = vmatprep.mubr.f32.mxu0 %v6844_v2 }
 0x24c   :  { %v5165_v59 = vpop.permute.xlu1 %5164  ;;  %v5173_v60 = vsel %vm513_vm4, %v5161_v57, %v5163_v26 }
 0x24d   :  { %5268 = vmatprep.subr.mxu1 %v5173_v60  ;;  %v5174_v4 = vsel %vm513_vm4, %v5163_v26, %v5165_v59 }
 0x24e   :  { %6683 = vmatmul.mubr.msk.f32.gmra.mrb[64].mxu0 %vm4788_vm6, %v6681_v58  ;;  %5269 = vmatpush1.msra.mxu1 %v5172_v61 }
 0x24f   :  { %6684 = vmatmul.mubr.msk.f32.vlgmr.msra.gmra.mrb[62].mxu1 %vm4788_vm6, %v6680_v23  ;;  %v5167_v62 = vpop.permute.xlu0 %5166  ;;  %5409 = vmatprep.mubr.f32.mxu0 %v6844_v2 }
 0x250   :  { %v5169_v63 = vpop.permute.xlu1 %5168  ;;  %v5175_v1 = vsel %vm513_vm4, %v5165_v59, %v5167_v62  ;;  %5338 = vmatprep.mubr.f32.mxu1 %v6844_v2 }
 0x251   :  { %v5176_v9 = vsel %vm513_vm4, %v5167_v62, %v5169_v63  ;;  %5345 = vmatprep.subr.mxu0 %v5175_v1  ;;  %5422 = vmatprep.subr.mxu1 %v5169_v63 }
 0x252   :  { %5346 = vmatpush1.msra.mxu0 %v5174_v4  ;;  %5423 = vmatpush1.msra.mxu1 %v5176_v9 }
 0x253   :  { %6685 = vmatmul.mubr.msk.f32.gmra.mrb[64].mxu1 %vm4788_vm6, %v6681_v58  ;;  %6686 = vmatmul.mubr.msk.f32.vlgmr.msra.gmra.mrb[66].mxu0 %vm4788_vm6, %v6680_v23 }
 0x254   :  { %5564 = vmatprep.subr.mxu0 %v7550_v17  ;;  %5641 = vmatprep.subr.mxu1 %v7567_v22 }
 0x255   :  { %5565 = vmatpush1.msra.mxu0 %v7548_v38  ;;  %5415 = vmatprep.mubr.f32.mxu0 %v6844_v2 }
 0x256   :  { %5718 = vmatprep.subr.mxu0 %v4764_v46  ;;  %5486 = vmatprep.mubr.f32.mxu1 %v6844_v2 }
 0x257   :  { %6687 = vmatmul.mubr.msk.f32.gmra.mrb[68].mxu0 %vm4788_vm6, %v6681_v58  ;;  %6688 = vmatmul.mubr.msk.f32.vlgmr.msra.gmra.mrb[66].mxu1 %vm4788_vm6, %v6680_v23 }
 0x258   :  { %5642 = vmatpush1.msra.mxu1 %v7553_v21  ;;  %5492 = vmatprep.mubr.f32.mxu1 %v6844_v2 }
 0x259   :  { %5795 = vmatprep.subr.mxu1 %v5557_v12  ;;  %5628 = vmatprep.mubr.f32.mxu0 %v6844_v2 }
 0x25b   :  { %6689 = vmatmul.mubr.msk.f32.gmra.mrb[68].mxu1 %vm4788_vm6, %v6681_v58  ;;  %6692 = vmatmul.mubr.msk.f32.vlgmr.msra.gmra.mrb[70].mxu0 %vm4788_vm6, %v6690_v13 }
 0x25c   :  { %5719 = vmatpush1.msra.mxu0 %v7570_v19  ;;  %5634 = vmatprep.mubr.f32.mxu0 %v6844_v2 }
 0x25d   :  { %5705 = vmatprep.mubr.f32.mxu1 %v6844_v2 }
 0x25f   :  { %6693 = vmatmul.mubr.msk.f32.gmra.mrb[72].mxu0 %vm4788_vm6, %v6691_v14  ;;  %6694 = vmatmul.mubr.msk.f32.vlgmr.msra.gmra.mrb[70].mxu1 %vm4788_vm6, %v6690_v13 }
 0x260   :  { %5796 = vmatpush1.msra.mxu1 %v4765_v41  ;;  %5711 = vmatprep.mubr.f32.mxu1 %v6844_v2  ;;  %v7680_v55 = vpop.permute.xlu0 %5922 }
 0x261   :  { %5782 = vmatprep.mubr.f32.mxu0 %v6844_v2 }
 0x263   :  { %6695 = vmatmul.mubr.msk.f32.gmra.mrb[72].mxu1 %vm4788_vm6, %v6691_v14  ;;  %6696 = vmatmul.mubr.msk.f32.vlgmr.msra.gmra.mrb[74].mxu0 %vm4788_vm6, %v6690_v13 }
 0x264   :  { %5788 = vmatprep.mubr.f32.mxu0 %v6844_v2  ;;  %5859 = vmatprep.mubr.f32.mxu1 %v6844_v2 }
 0x267   :  { %6697 = vmatmul.mubr.msk.f32.gmra.mrb[76].mxu0 %vm4788_vm6, %v6691_v14  ;;  %6698 = vmatmul.mubr.msk.f32.vlgmr.msra.gmra.mrb[74].mxu1 %vm4788_vm6, %v6690_v13 }
 0x268   :  { %5865 = vmatprep.mubr.f32.mxu1 %v6844_v2  ;;  %6073 = vmatprep.mubr.f32.mxu0 %v6844_v2 }
 0x26b   :  { %6699 = vmatmul.mubr.msk.f32.gmra.mrb[76].mxu1 %vm4788_vm6, %v6691_v14 }
 0x26c   :  { %6146 = vmatprep.mubr.f32.mxu1 %v6844_v2 }
 0x2a4   :  { %v4861_v15 = vpop.f32.mrb[54].mxu0 }
 0x2a5   :  { %v4863_v16 = vpop.f32.mrb[55].mxu0 }
 0x2a7   :  { %v4938_v25 = vpop.f32.mrb[54].mxu1 }
 0x2a8   :  { %v4940_v28 = vpop.f32.mrb[55].mxu1 }
 0x2aa   :  { %v4867_v29 = vpop.f32.mrb[56].mxu0 }
 0x2ab   :  { %v4869_v30 = vpop.f32.mrb[57].mxu0 }
 0x2ac   :  { %v4944_v31 = vpop.f32.mrb[56].mxu1 }
 0x2ad   :  { %v4946_v32 = vpop.f32.mrb[57].mxu1 }
 0x2ae   :  { %v5015_v33 = vpop.f32.mrb[58].mxu0 }
 0x2af   :  { %v5017_v34 = vpop.f32.mrb[59].mxu0 }
 0x2b0   :  { %v5092_v35 = vpop.f32.mrb[58].mxu1 }
 0x2b1   :  { %v5094_v3 = vpop.f32.mrb[59].mxu1 }
 0x2b2   :  { %v5021_v36 = vpop.f32.mrb[60].mxu0  ;;  %5110 = vst.msk [vmem:[#allocation3 + $0x38] sm:$0xff] %vm513_vm4, %v5094_v3 }
 0x2b3   :  { %v5023_v0 = vpop.f32.mrb[61].mxu0 }
 0x2b4   :  { %v5098_v7 = vpop.f32.mrb[60].mxu1 }
 0x2b5   :  { %v5100_v5 = vpop.f32.mrb[61].mxu1 }
 0x2b6   :  { %5118 = vst.msk [vmem:[#allocation3 + $0x78] sm:$0xff] %vm513_vm4, %v5100_v5 }
 0x2b9   :  { %v5126_v51 = vld [vmem:[#allocation3 + $0x38] sm:$0xff] }
 0x2bd   :  { %v5134_v58 = vld [vmem:[#allocation3 + $0x78] sm:$0xff] }
 0x31d   :  { %v5257_v8 = vpop.f32.mrb[62].mxu0 }
 0x31e   :  { %v5499_v6 = vadd.f32 %v5257_v8, %v4861_v15  ;;  %v5259_v10 = vpop.f32.mrb[63].mxu0 }
 0x31f   :  { %v5500_v11 = vadd.f32 %v5259_v10, %v4863_v16 }
 0x321   :  { %v5263_v38 = vpop.f32.mrb[64].mxu0 }
 0x322   :  { %v5507_v17 = vadd.f32 %v5263_v38, %v4867_v29  ;;  %v5265_v40 = vpop.f32.mrb[65].mxu0  ;;  %v5334_v18 = vpop.f32.mrb[62].mxu1 }
 0x323   :  { %v5508_v21 = vadd.f32 %v5265_v40, %v4869_v30  ;;  %v5501_v37 = vadd.f32 %v5334_v18, %v4938_v25  ;;  %v5336_v27 = vpop.f32.mrb[63].mxu1  ;;  %v7688_v25 = vpop.permute.xlu1 %5927 }
 0x324   :  { %v5502_v24 = vadd.f32 %v5336_v27, %v4940_v28 }
 0x326   :  { %v5340_v20 = vpop.f32.mrb[64].mxu1  ;;  %v5411_v44 = vpop.f32.mrb[66].mxu0 }
 0x327   :  { %v5509_v22 = vadd.f32 %v5340_v20, %v4944_v31  ;;  %v5503_v45 = vadd.f32 %v5411_v44, %v5015_v33  ;;  %v5342_v39 = vpop.f32.mrb[65].mxu1  ;;  %v5413_v19 = vpop.f32.mrb[67].mxu0 }
 0x328   :  { %v5510_v46 = vadd.f32 %v5342_v39, %v4946_v32  ;;  %v5504_v47 = vadd.f32 %v5413_v19, %v5017_v34 }
 0x32a   :  { %v5417_v41 = vpop.f32.mrb[68].mxu0  ;;  %v5488_v48 = vpop.f32.mrb[66].mxu1 }
 0x32b   :  { %v5511_v49 = vadd.f32 %v5417_v41, %v5021_v36  ;;  %v5505_v43 = vadd.f32 %v5488_v48, %v5092_v35  ;;  %v5419_v50 = vpop.f32.mrb[69].mxu0  ;;  %v5490_v52 = vpop.f32.mrb[67].mxu1 }
 0x32c   :  { %v7678_v53 = vadd.f32 %v5419_v50, %v5023_v0  ;;  %v5506_v54 = vadd.f32 %v5490_v52, %v5126_v51 }
 0x32e   :  { %5522 = vst.msk [vmem:[#allocation3 + $0x38] sm:$0xff] %vm513_vm4, %v5506_v54  ;;  %v5494_v23 = vpop.f32.mrb[68].mxu1  ;;  %v5630_v56 = vpop.f32.mrb[70].mxu0 }
 0x32f   :  { %v7683_v57 = vadd.f32 %v5494_v23, %v5098_v7  ;;  %v5872_v26 = vadd.f32 %v5630_v56, %v5499_v6  ;;  %v5496_v59 = vpop.f32.mrb[69].mxu1  ;;  %v5632_v60 = vpop.f32.mrb[71].mxu0 }
 0x330   :  { %v5514_v61 = vadd.f32 %v5496_v59, %v5134_v58  ;;  %v5873_v62 = vadd.f32 %v5632_v60, %v5500_v11 }
 0x331   :  { %v5930_v63 = vadd.f32 %v7680_v55, %v5872_v26 }
 0x332   :  { %5530 = vst.msk [vmem:[#allocation3 + $0x78] sm:$0xff] %vm513_vm4, %v5514_v61  ;;  %v5636_v1 = vpop.f32.mrb[72].mxu0  ;;  %v5707_v4 = vpop.f32.mrb[70].mxu1  ;;  %v5931_v9 = vadd.f32 %v7680_v55, %v5873_v62 }
 0x333   :  { %v5880_v12 = vadd.f32 %v5636_v1, %v5507_v17  ;;  %v5874_v13 = vadd.f32 %v5707_v4, %v5501_v37  ;;  %v5638_v14 = vpop.f32.mrb[73].mxu0  ;;  %v5709_v15 = vpop.f32.mrb[71].mxu1  ;;  %v5946_v16 = vmax.f32 %v5930_v63, 0.0 }
 0x334   :  { %v5881_v28 = vadd.f32 %v5638_v14, %v5508_v21  ;;  %v5875_v29 = vadd.f32 %v5709_v15, %v5502_v24  ;;  %v5947_v30 = vmax.f32 %v5931_v9, 0.0 }
 0x335   :  { %v5938_v31 = vadd.f32 %v7688_v25, %v5880_v12  ;;  %v5932_v32 = vadd.f32 %v7680_v55, %v5874_v13  ;;  %v29_v13 = vld [vmem:[%s7771_s5 + $0x18] sm:$0xff] }
 0x336   :  { %v5939_v33 = vadd.f32 %v7688_v25, %v5881_v28  ;;  %v5713_v34 = vpop.f32.mrb[72].mxu1  ;;  %v5784_v35 = vpop.f32.mrb[74].mxu0  ;;  %v5933_v3 = vadd.f32 %v7680_v55, %v5875_v29  ;;  %v31_v28 = vld [vmem:[%s7771_s5 + $0x28] sm:$0xff]  ;;  %v30_v29 = vld [vmem:[%s7771_s5 + $0x20] sm:$0xff] }
 0x337   :  { %v5954_v36 = vmax.f32 %v5938_v31, 0.0  ;;  %v5882_v0 = vadd.f32 %v5713_v34, %v5509_v22  ;;  %v5876_v7 = vadd.f32 %v5784_v35, %v5503_v45  ;;  %v5715_v5 = vpop.f32.mrb[73].mxu1  ;;  %v5786_v8 = vpop.f32.mrb[75].mxu0  ;;  %v5948_v6 = vmax.f32 %v5932_v32, 0.0  ;;  %v32_v35 = vld [vmem:[%s7774_s6] sm:$0x1f] }
 0x338   :  { %v5955_v10 = vmax.f32 %v5939_v33, 0.0  ;;  %v5883_v11 = vadd.f32 %v5715_v5, %v5510_v46  ;;  %v5877_v38 = vadd.f32 %v5786_v8, %v5504_v47  ;;  %v5949_v17 = vmax.f32 %v5933_v3, 0.0  ;;  %v5538_v47 = vld [vmem:[#allocation3 + $0x38] sm:$0xff] }
 0x339   :  { %v5940_v40 = vadd.f32 %v7688_v25, %v5882_v0  ;;  %v5934_v18 = vadd.f32 %v7680_v55, %v5876_v7  ;;  %v6804_v21 = vpack.i.bf16 %v5948_v6, %v5947_v30  ;;  %v6778_v37 = vpack.c.bf16 %v5954_v36, %v5946_v16  ;;  %v5546_v63 = vld [vmem:[#allocation3 + $0x78] sm:$0xff] }
 0x33a   :  { %v5941_v27 = vadd.f32 %v7688_v25, %v5883_v11  ;;  %v5935_v24 = vadd.f32 %v7680_v55, %v5877_v38  ;;  %v5790_v20 = vpop.f32.mrb[76].mxu0  ;;  %v5861_v44 = vpop.f32.mrb[74].mxu1  ;;  %v6776_v22 = vpack.c.bf16 %v5955_v10, %v5947_v30  ;;  %v6447_v3 = vmul.f32 0.7615942, %v32_v35 }
 0x33b   :  { %v5956_v45 = vmax.f32 %v5940_v40, 0.0  ;;  %v5950_v39 = vmax.f32 %v5934_v18, 0.0  ;;  %v5884_v19 = vadd.f32 %v5790_v20, %v5511_v49  ;;  %v5878_v41 = vadd.f32 %v5861_v44, %v5505_v43  ;;  %v5792_v46 = vpop.f32.mrb[77].mxu0  ;;  %v5863_v48 = vpop.f32.mrb[75].mxu1  ;;  %6805 = vrot.lane.b32.xlu1 %v6804_v21, %s6847_s18  ;;  %v5978_v49 = vld [vmem:[%s7773_s4] sm:$0xff] }
 0x33c   :  { %v5957_v50 = vmax.f32 %v5941_v27, 0.0  ;;  %v5951_v51 = vmax.f32 %v5935_v24, 0.0  ;;  %v5885_v52 = vadd.f32 %v5792_v46, %v7678_v53  ;;  %v5879_v54 = vadd.f32 %v5863_v48, %v5538_v47  ;;  %6777 = vmatprep.subr.bf16.mxu1 %v6776_v22 }
 0x33d   :  { %v5942_v23 = vadd.f32 %v7688_v25, %v5884_v19  ;;  %v5936_v56 = vadd.f32 %v7680_v55, %v5878_v41  ;;  %6779 = vmatpush1.bf16.msra.mxu1 %v6778_v37  ;;  %v6809_v26 = vpack.i.bf16 %v5956_v45, %v5955_v10  ;;  %v6850_v0 = vmov 3  }
 0x33e   :  { %v5943_v43 = vadd.f32 %v7688_v25, %v5885_v52  ;;  %5895 = vst.msk [vmem:[#allocation3 + $0x38] sm:$0xff] %vm513_vm4, %v5879_v54  ;;  %v5867_v58 = vpop.f32.mrb[76].mxu1  ;;  %v6814_v59 = vpack.i.bf16 %v5951_v51, %v5950_v39  ;;  %v7707_v53 = vpack.c.bf16 %v5957_v50, %v5949_v17  ;;  %v6851_v7 = vmov 2   ;;  %v6703_v52 = vld [vmem:[%s7773_s4 + $0x10] sm:$0xff]  ;;  %v6705_v54 = vld [vmem:[%s7773_s4 + $0x18] sm:$0xff] }
 0x33f   :  { %v5958_v60 = vmax.f32 %v5942_v23, 0.0  ;;  %v5952_v61 = vmax.f32 %v5936_v56, 0.0  ;;  %v5886_v62 = vadd.f32 %v5867_v58, %v7683_v57  ;;  %v5869_v1 = vpop.f32.mrb[77].mxu1  ;;  %6810 = vrot.lane.b32.xlu0 %v6809_v26, %s6847_s18  ;;  %v6852_v5 = vmov 4   ;;  %v6707_v23 = vld [vmem:[%s7773_s4 + $0x20] sm:$0xff] }
 0x340   :  { %v5959_v4 = vmax.f32 %v5943_v43, 0.0  ;;  %v5887_v9 = vadd.f32 %v5869_v1, %v5546_v63  ;;  %6815 = vrot.lane.b32.xlu1 %v6814_v59, %s6847_s18  ;;  %6702 = vmatmul.mubr.msk.f32.vlgmr.msra.gmra.mrb[78].mxu1 %vm6005_vm7, %v5978_v49  ;;  %v6853_v8 = vmov 1  }
 0x341   :  { %v5944_v12 = vadd.f32 %v7688_v25, %v5886_v62  ;;  %v6780_v14 = vpack.c.bf16 %v5958_v60, %v5950_v39  ;;  %6323 = vmatprep.mubr.f32.mxu1 %v6844_v2  ;;  %v6700_v39 = vld [vmem:[%s7773_s4 + $0x8] sm:$0xff] }
 0x342   :  { %5903 = vst.msk [vmem:[#allocation3 + $0x78] sm:$0xff] %vm513_vm4, %v5887_v9  ;;  %v6819_v57 = vpack.i.bf16 %v5959_v4, %v5958_v60 }
 0x343   :  { %v5960_v15 = vmax.f32 %v5944_v12, 0.0 }
 0x344   :  { %6412 = vperm.xlu1 %6802, %v29_v13   ;;  %6820 = vrot.lane.b32.xlu0 %v6819_v57, %s6847_s18  ;;  %v6436_v13 = vlaneseq }
 0x345   :  { %v5911_v16 = vld [vmem:[#allocation3 + $0x38] sm:$0xff]  ;;  %v7726_v30 = vpack.c.bf16 %v5960_v15, %v5952_v61 }
 0x346   :  { %v5937_v31 = vadd.f32 %v7680_v55, %v5911_v16  ;;  %v6449_v55 = vrot.slane %v6447_v3, 6  ;;  %v6437_v15 = vshrl.u32 %v6436_v13, 7 }
 0x348   :  { %v5953_v32 = vmax.f32 %v5937_v31, 0.0  ;;  %6432 = vperm.xlu1 %6802, %v31_v28   ;;  %6419 = vperm.xlu0 %6803, %v30_v29   ;;  %v6438_v29 = vsub.s32 0, %v6437_v15  ;;  %v6429_v31 = vld [vmem:[%s7775_s1] sm:$0x3] }
 0x349   :  { %v5919_v33 = vld [vmem:[#allocation3 + $0x78] sm:$0xff] }
 0x34a   :  { %5969 = vst.msk [vmem:[#allocation3 + $0x38] sm:$0xff] %vm513_vm4, %v5953_v32  ;;  %v5945_v34 = vadd.f32 %v7688_v25, %v5919_v33  ;;  %v6451_v25 = vadd.f32 %v6449_v55, %v31_v28  ;;  %v6439_v33 = vrot.slane %v6429_v31, %v6438_v29 }
 0x34c   :  { %v5961_v36 = vmax.f32 %v5945_v34, 0.0  ;;  %6825 = vset.pattern.permute.xlu1 %v6850_v0  ;;  %6824 = vset.pattern.permute.xlu0 %v6851_v7 }
 0x34d   :  { %6483 = vperm.xlu1 %6825, %v32_v35   ;;  %6472 = vperm.xlu0 %6824, %v32_v35  }
 0x34e   :  { %5977 = vst.msk [vmem:[#allocation3 + $0x78] sm:$0xff] %vm513_vm4, %v5961_v36 }
 0x351   :  { %6826 = vset.pattern.permute.xlu1 %v6852_v5  ;;  %6827 = vset.pattern.permute.xlu0 %v6853_v8  ;;  %v6333_v48 = vld [vmem:[#allocation3 + $0x38] sm:$0xff] }
 0x352   :  { %6494 = vperm.xlu1 %6826, %v32_v35   ;;  %6454 = vperm.xlu0 %6827, %v32_v35  }
 0x355   :  { %v6335_v19 = vld [vmem:[#allocation3 + $0x78] sm:$0xff] }
 0x356   :  { %6828 = vset.pattern.permute.xlu1 %v6849_v42  ;;  %6829 = vset.pattern.permute.xlu0 %v6852_v5  ;;  %v6788_v51 = vpack.c.bf16 %v6335_v19, %v6333_v48 }
 0x357   :  { %6464 = vperm.xlu1 %6828, %v6451_v25  }
 0x3ad   :  { %v6806_v6 = vpop.permute.xlu1 %6805 }
 0x3ae   :  { %v6808_v10 = vunpack.i.h.bf16 %v6806_v6  ;;  %v6807_v11 = vunpack.i.l.bf16 %v6806_v6 }
 0x3b0   :  { %v5999_v21 = vsel %vm513_vm4, %v6807_v11, %v6808_v10 }
 0x3b1   :  { %v6811_v38 = vpop.permute.xlu0 %6810 }
 0x3b2   :  { %v6813_v17 = vunpack.i.h.bf16 %v6811_v38  ;;  %v6812_v40 = vunpack.i.l.bf16 %v6811_v38  ;;  %v6816_v18 = vpop.permute.xlu1 %6815 }
 0x3b3   :  { %v6818_v20 = vunpack.i.h.bf16 %v6816_v18  ;;  %v6817_v44 = vunpack.i.l.bf16 %v6816_v18 }
 0x3b4   :  { %v6772_v37 = vpack.c.bf16 %v6813_v17, %v6808_v10  ;;  %v6000_v27 = vsel %vm513_vm4, %v6812_v40, %v6813_v17 }
 0x3b5   :  { %v6774_v24 = vpack.c.bf16 %v6000_v27, %v5999_v21  ;;  %v6250_v41 = vsel %vm513_vm4, %v6817_v44, %v6818_v20 }
 0x3b6   :  { %6773 = vmatprep.subr.bf16.mxu0 %v6772_v37  ;;  %v6821_v22 = vpop.permute.xlu0 %6820 }
 0x3b7   :  { %v6823_v42 = vunpack.i.h.bf16 %v6821_v22  ;;  %v6822_v45 = vunpack.i.l.bf16 %v6821_v22  ;;  %6775 = vmatpush1.bf16.msra.mxu0 %v6774_v24 }
 0x3b8   :  { %6781 = vmatprep.subr.bf16.mxu0 %v6780_v14 }
 0x3b9   :  { %v6784_v46 = vpack.c.bf16 %v6823_v42, %v6818_v20  ;;  %v6251_v47 = vsel %vm513_vm4, %v6822_v45, %v6823_v42 }
 0x3ba   :  { %v6786_v50 = vpack.c.bf16 %v6251_v47, %v6250_v41  ;;  %6701 = vmatmul.mubr.msk.f32.vlgmr.msra.gmra.mrb[78].mxu0 %vm6005_vm7, %v6700_v39 }
 0x3bb   :  { %6783 = vmatpush1.bf16.msra.mxu0 %v7707_v53  ;;  %6785 = vmatprep.subr.bf16.mxu1 %v6784_v46 }
 0x3bc   :  { %6787 = vmatpush1.bf16.msra.mxu1 %v6786_v50  ;;  %6789 = vmatprep.subr.bf16.mxu0 %v6788_v51 }
 0x3bd   :  { %6225 = vmatprep.mubr.f32.mxu0 %v6844_v2 }
 0x3be   :  { %6704 = vmatmul.mubr.msk.f32.vlgmr.msra.gmra.mrb[80].mxu0 %vm6005_vm7, %v6703_v52 }
 0x3bf   :  { %6791 = vmatpush1.bf16.msra.mxu0 %v7726_v30  ;;  %6706 = vmatmul.mubr.msk.f32.vlgmr.msra.gmra.mrb[80].mxu1 %vm6005_vm7, %v6705_v54 }
 0x3c0   :  { %6403 = vmatprep.mubr.f32.mxu0 %v6844_v2 }
 0x3c2   :  { %6708 = vmatmul.mubr.msk.f32.vlgmr.msra.gmra.mrb[82].mxu0 %vm6005_vm7, %v6707_v23 }
 0x3c3   :  { %v6413_v12 = vpop.permute.xlu1 %6412 }
 0x3c7   :  { %v6420_v57 = vpop.permute.xlu0 %6419  ;;  %v6433_v35 = vpop.permute.xlu1 %6432 }
 0x3c8   :  { %v6441_v36 = vmul.f32 %v6439_v33, %v6433_v35  ;;  %v6443_v7 = vrot.slane %v6433_v35, 1 }
 0x3cc   :  { %v6484_v8 = vpop.permute.xlu1 %6483  ;;  %v6473_v10 = vpop.permute.xlu0 %6472 }
 0x3d1   :  { %v6495_v11 = vpop.permute.xlu1 %6494  ;;  %v6455_v27 = vpop.permute.xlu0 %6454 }
 0x3d6   :  { %v6465_v44 = vpop.permute.xlu1 %6464 }
 0x413   :  { %v6148_v56 = vpop.f32.mrb[78].mxu1 }
 0x414   :  { %v6150_v26 = vpop.f32.mrb[79].mxu1 }
 0x48d   :  { %v6075_v49 = vpop.f32.mrb[78].mxu0 }
 0x48e   :  { %v6149_v43 = vadd.f32 %v6148_v56, %v6075_v49  ;;  %v6077_v58 = vpop.f32.mrb[79].mxu0 }
 0x491   :  { %v6227_v59 = vpop.f32.mrb[80].mxu0 }
 0x492   :  { %v6231_v53 = vadd.f32 %v6227_v59, %v6149_v43  ;;  %v6325_v60 = vpop.f32.mrb[80].mxu1  ;;  %v6229_v61 = vpop.f32.mrb[81].mxu0 }
 0x493   :  { %v6327_v62 = vpop.f32.mrb[81].mxu1 }
 0x494   :  { %v6329_v63 = vadd.f32 %v6325_v60, %v6231_v53 }
 0x495   :  { %v6405_v1 = vpop.f32.mrb[82].mxu0 }
 0x496   :  { %v6409_v4 = vadd.f32 %v6405_v1, %v6329_v63  ;;  %v6407_v9 = vpop.f32.mrb[83].mxu0 }
 0x498   :  { %v6415_v14 = vadd.f32 %v6413_v12, %v6409_v4 }
 0x49a   :  { %v6416_v2 = vmax.f32 %v6415_v14, 0.0 }
 0x49c   :  { %v6422_v16 = vmul.f32 %v6420_v57, %v6416_v2 }
 0x49e   :  { %v6423_v28 = vrot.slane %v6422_v16, 4 }
 0x4a0   :  { %v6424_v30 = vadd.f32 %v6423_v28, %v6422_v16 }
 0x4a2   :  { %v6425_v32 = vrot.slane %v6424_v30, 2 }
 0x4a4   :  { %v6426_v34 = vadd.f32 %v6425_v32, %v6424_v30 }
 0x4a6   :  { %v6427_v3 = vrot.slane %v6426_v34, 1 }
 0x4a8   :  { %v6428_v0 = vadd.f32 %v6427_v3, %v6426_v34 }
 0x4aa   :  { %v6442_v55 = vadd.f32 %v6441_v36, %v6428_v0 }
 0x4ac   :  { %v6445_v5 = vadd.f32 %v6443_v7, %v6442_v55 }
 0x4ae   :  { %6842 = vtanh.f32 %v6445_v5 }
 0x4b8   :  { %v6843_v25 = vpop.eup %6842 }
 0x4b9   :  { %v6460_v6 = vrot.slane %v6843_v25, %v6438_v29 }
 0x4bb   :  { %v6486_v38 = vmul.f32 %v6484_v8, %v6460_v6  ;;  %v6475_v17 = vmul.f32 %v6473_v10, %v6460_v6  ;;  %v6497_v21 = vmul.f32 %v6495_v11, %v6460_v6  ;;  %v6461_v24 = vmul.f32 %v6460_v6, %v6455_v27 }
 0x4bd   :  { %v6488_v40 = vrot.slane %v6486_v38, 6  ;;  %v6477_v18 = vrot.slane %v6475_v17, 6  ;;  %v6499_v37 = vrot.slane %v6497_v21, 6  ;;  %v6468_v20 = vrot.slane %v6461_v24, 6 }
 0x4bf   :  { %6489 = vrot.lane.b32.xlu0 %v6488_v40, %s6847_s18  ;;  %6478 = vrot.lane.b32.xlu1 %v6477_v18, %s6845_s28  ;;  %v6470_v22 = vadd.f32 %v6468_v20, %v6465_v44 }
 0x4c3   :  { %6500 = vrot.lane.b32.xlu1 %v6499_v37, %s6848_s11 }
 0x531   :  { %v6479_v42 = vpop.permute.xlu1 %6478  ;;  %v6490_v39 = vpop.permute.xlu0 %6489 }
 0x532   :  { %v6481_v45 = vadd.f32 %v6479_v42, %v6470_v22 }
 0x534   :  { %v6492_v19 = vadd.f32 %v6490_v39, %v6481_v45 }
 0x535   :  { %v6501_v41 = vpop.permute.xlu1 %6500 }
 0x536   :  { %v6503_v46 = vadd.f32 %v6501_v41, %v6492_v19 }
 0x538   :  { %v6504_v47 = vmax.f32 %v6503_v46, 0.0 }
 0x53a   :  { %6506 = vst.msk [vmem:[%s7776_s7 - $0x2] sm:$0x7c] %vm6505_vm8, %v6504_v47 }

</bundles_post_ra>
